<compile_context>
chip_gen: v7x
topology: tpu7x:2x2x1
jax: 0.10.0
libtpu: 0.0.40
codegen_flags: <defaults>
</compile_context>

<pallas_src>
import jax
import jax.numpy as jnp
from jax.experimental import pallas as pl
from jax.experimental.pallas import tpu as pltpu


def _vq_kernel(flat_ref, emb_ref, e2_ref, idx_ref, sse_ref):
    """Per-tile: distances -> argmin index + per-row squared error."""
    flat = flat_ref[...]                                # (TB, F) f32
    emb = emb_ref[...]                                  # (E_pad, F) f32|bf16, VMEM resident

    # cross = flat @ emb^T, contracting dim 1 of BOTH operands so the codebook
    # stays in its native (E_pad, F) layout (no in-kernel transpose).
    # HIGHEST precision keeps ~f32 accuracy for argmin parity with torch f32;
    # in the opt-in bf16 path operands are already bf16.
    prec = (jax.lax.Precision.HIGHEST if emb.dtype == jnp.float32
            else jax.lax.Precision.DEFAULT)
    cross = jax.lax.dot_general(
        flat.astype(emb.dtype), emb,
        dimension_numbers=(((1,), (1,)), ((), ())),
        preferred_element_type=jnp.float32,
        precision=prec)                                  # (TB, E_pad) on MXU

    # |x|^2 is a per-row constant (argmin-invariant) -> dropped from dist.
    # Padded codebook rows carry |e|^2 = 1e30 so they never win the argmin.
    dist = e2_ref[...] - 2.0 * cross                     # (TB, E_pad)

    # first-min tie semantics, matching torch.argmin.
    idx_ref[...] = jnp.argmin(dist, axis=1, keepdims=True).astype(jnp.int32)

    # per-row squared error: ||x - e_j||^2 = ||x||^2 + min_j dist_j.
    # Garbage rows of a partial last tile flow through here but their outputs
    # are masked on store, so nothing invalid reaches HBM.
    x2 = jnp.sum(flat * flat, axis=1, keepdims=True)
    sse_ref[...] = x2 + jnp.min(dist, axis=1, keepdims=True)


def _vmem_budgets():
    """Generation-aware (tile budget, vmem_limit) in bytes."""
    try:
        cap = int(pltpu.get_tpu_info().vmem_capacity_bytes)
    except Exception:
        cap = 64 * 1024 * 1024          # conservative: safe on every generation
    return int(cap * 0.70), int(cap * 0.90)


def _choose_tile_b(B, F, E_pad, budget_bytes, codebook_double_buffered):
    """Pick the largest legal batch tile that fits the VMEM budget."""
    nbuf = 2 if codebook_double_buffered else 1
    resident = nbuf * (E_pad * F + 8 * E_pad) * 4        # codebook + |e|^2 block
    if resident > budget_bytes - (2 << 20):
        # TODO(synk): implement the F-chunked variant instead of failing.
        raise ValueError(
            f"codebook needs {resident / 2**20:.1f} MiB resident but the VMEM "
            f"budget is {budget_bytes / 2**20:.1f} MiB; F-chunking not implemented")
    # per row: double-buffered flat tile + cross/dist temporaries + slack.
    per_row = 4 * (2 * F + 4 * E_pad + 64)
    tb = (budget_bytes - resident) // per_row
    tb = int(max(8, min(tb, 1024)))
    if tb >= B:
        tb = B                            # full axis is always a legal block
    else:
        tb = max(8, (tb // 8) * 8)        # sublane multiple
    # v7x megacore: keep >= 2 "parallel" tiles so both TensorCores get work.
    if B >= 16:
        half = ((pl.cdiv(B, 2) + 7) // 8) * 8
        tb = min(tb, half)
    return tb


def _run_kernel(flat, emb_kernel, e2_pad, B, F, E_pad, single_buffer_codebook):
    budget, vmem_limit = _vmem_budgets()
    TB = _choose_tile_b(B, F, E_pad, budget,
                        codebook_double_buffered=not single_buffer_codebook)
    grid = (pl.cdiv(B, TB),)

    resident_kwargs = {}
    if single_buffer_codebook:
        # Constant index_map => the second pipeline buffer is never filled;
        # single-buffering frees E_pad*F*4 bytes of VMEM (biggest lever on v7x).
        resident_kwargs = dict(pipeline_mode=pl.Buffered(1))

    return pl.pallas_call(
        _vq_kernel,
        out_shape=(
            jax.ShapeDtypeStruct((B, 1), jnp.int32),     # code indices
            jax.ShapeDtypeStruct((B, 1), jnp.float32),   # per-row SSE
        ),
        grid=grid,
        in_specs=[
            pl.BlockSpec((TB, F), lambda i: (i, 0)),                      # flat, tiled over B
            pl.BlockSpec((E_pad, F), lambda i: (0, 0), **resident_kwargs),  # codebook, resident
            pl.BlockSpec((1, E_pad), lambda i: (0, 0), **resident_kwargs),  # |e|^2, resident
        ],
        out_specs=(
            pl.BlockSpec((TB, 1), lambda i: (i, 0)),
            pl.BlockSpec((TB, 1), lambda i: (i, 0)),
        ),
        compiler_params=pltpu.CompilerParams(
            dimension_semantics=("parallel",),
            vmem_limit_bytes=vmem_limit,
        ),
    )(flat, emb_kernel, e2_pad)


def vector_quantizer_forward(inputs, embeddings, commitment_cost,
                             *, use_bf16_distances=False):
    """JAX/Pallas forward of VectorQuantizer_Instance_Vr_All (vq_rotate=False).

    Args:
      inputs:     (B, C, D, H, W) float32
      embeddings: (E, F) float32 with F == C*D*H*W
      commitment_cost: python float
      use_bf16_distances: opt-in bf16 MXU operands for the distance matmul
        (~3x faster f32-emulated matmul); near-tie argmin can flip vs torch.

    Returns:
      (loss, quantized, perplexity, encodings)
    """
    B, C, D, H, W = inputs.shape
    F = C * D * H * W
    E, F_emb = embeddings.shape
    assert F == F_emb, "embedding_dim must equal C*D*H*W"

    flat = inputs.reshape(B, F)

    # Pad the codebook axis to a multiple of 128 (full lane width); padded rows
    # get |e|^2 = 1e30 sentinels so they never win the argmin.
    E_pad = ((E + 127) // 128) * 128
    e2 = jnp.sum(embeddings * embeddings, axis=1)               # hoisted, once
    if E_pad != E:
        emb_pad = jnp.concatenate(
            [embeddings, jnp.zeros((E_pad - E, F), embeddings.dtype)], axis=0)
        e2_pad = jnp.concatenate(
            [e2, jnp.full((E_pad - E,), 1e30, dtype=e2.dtype)])
    else:
        emb_pad, e2_pad = embeddings, e2
    e2_pad = e2_pad[None, :]                                    # (1, E_pad)

    emb_kernel = emb_pad.astype(jnp.bfloat16) if use_bf16_distances else emb_pad

    try:
        idx, sse_rows = _run_kernel(flat, emb_kernel, e2_pad, B, F, E_pad,
                                    single_buffer_codebook=True)
    except Exception:
        # Fallback if this JAX/Mosaic build rejects Buffered(1) pipeline inputs:
        # identical semantics, just 2x codebook VMEM.
        idx, sse_rows = _run_kernel(flat, emb_kernel, e2_pad, B, F, E_pad,
                                    single_buffer_codebook=False)

    idx_flat = idx[:, 0]

    # Quantize = exact f32 row gather from the original codebook (XLA embedding
    # lookup). Replaces the former in-kernel one-hot matmul.
    quant_flat = jnp.take(embeddings, idx_flat, axis=0)
    quantized = quant_flat.reshape(B, C, D, H, W)

    # Forward-pass detach() is a numeric no-op, so q_latent == e_latent == mse
    # and loss = (1 + commitment_cost) * mse.
    mse = jnp.sum(jnp.maximum(sse_rows, 0.0)) * (1.0 / float(B * F))
    loss = (1.0 + float(commitment_cost)) * mse

    encodings = jax.nn.one_hot(idx_flat, E, dtype=jnp.float32)  # (B, E)
    avg_probs = jnp.mean(encodings, axis=0)
    perplexity = jnp.exp(-jnp.sum(avg_probs * jnp.log(avg_probs + 1e-10)))

    # Straight-through estimator is an identity in the forward pass.
    return loss, quantized, perplexity, encodings


def _reference_forward(inputs, embeddings, commitment_cost):
    """Pure-JAX reference for correctness checking."""
    B, C, D, H, W = inputs.shape
    flat = inputs.reshape(B, -1)
    hi = jax.lax.Precision.HIGHEST
    dist = (jnp.sum(flat ** 2, axis=1, keepdims=True)
            + jnp.sum(embeddings ** 2, axis=1)
            - 2.0 * jnp.matmul(flat, embeddings.T, precision=hi))
    idx = jnp.argmin(dist, axis=1)
    enc = jax.nn.one_hot(idx, embeddings.shape[0], dtype=jnp.float32)
    quant = embeddings[idx].reshape(inputs.shape)
    mse = jnp.mean((quant - inputs) ** 2)
    loss = (1.0 + commitment_cost) * mse
    avg = jnp.mean(enc, axis=0)
    perp = jnp.exp(-jnp.sum(avg * jnp.log(avg + 1e-10)))
    return loss, quant, perp, enc


if __name__ == "__main__":
    # small shapes consistent with the module: embedding_dim = C*D*H*W
    B, C, D, H, W = 2, 4, 4, 4, 4          # F = 256
    num_embeddings = 64
    embedding_dim = C * D * H * W
    commitment_cost = 0.25

    key = jax.random.PRNGKey(0)
    k_in, k_emb = jax.random.split(key)

    inputs = jax.random.normal(k_in, (B, C, D, H, W), dtype=jnp.float32)
    # deterministic init mimicking uniform_(-1/num_embeddings, 1/num_embeddings)
    limit = 1.0 / num_embeddings
    embeddings = jax.random.uniform(
        k_emb, (num_embeddings, embedding_dim),
        minval=-limit, maxval=limit, dtype=jnp.float32)

    loss, quantized, perplexity, encodings = vector_quantizer_forward(
        inputs, embeddings, commitment_cost)
    jax.block_until_ready((loss, quantized, perplexity, encodings))

    # sanity check against pure-JAX reference
    rl, rq, rp, re = _reference_forward(inputs, embeddings, commitment_cost)
    assert jnp.allclose(loss, rl, rtol=1e-4, atol=1e-5), (loss, rl)
    assert jnp.allclose(quantized, rq, rtol=1e-5, atol=1e-6)
    assert jnp.allclose(perplexity, rp, rtol=1e-5, atol=1e-6), (perplexity, rp)
    assert jnp.allclose(encodings, re)

    print("KERNEL_OK")
</pallas_src>

<mosaic_0001>
module attributes {stable_mosaic.version = 11 : i64} {
  func.func @_vq_kernel(%arg0: i32, %arg1: memref<2x256xf32, #tpu.memory_space<vmem>>, %arg2: memref<128x256xf32, #tpu.memory_space<vmem>>, %arg3: memref<1x128xf32, #tpu.memory_space<vmem>>, %arg4: memref<2x1xi32, #tpu.memory_space<vmem>>, %arg5: memref<2x1xf32, #tpu.memory_space<vmem>>) attributes {dimension_semantics = [#tpu.dimension_semantics<parallel>], iteration_bounds = array<i64: 1>, scalar_prefetch = 0 : i64, scratch_operands = 0 : i64, tpu.core_type = #tpu.core_type<tc>, window_params = [{transform_indices = @transform_0, window_bounds = array<i64: 2, 256>}, {pipeline_mode = #tpu.pipeline_mode<synchronous>, transform_indices = @transform_1, window_bounds = array<i64: 128, 256>}, {pipeline_mode = #tpu.pipeline_mode<synchronous>, transform_indices = @transform_2, window_bounds = array<i64: 1, 128>}, {transform_indices = @transform_3, window_bounds = array<i64: 2, 1>}, {transform_indices = @transform_4, window_bounds = array<i64: 2, 1>}]} {
    %c0 = arith.constant 0 : index
    %c0_0 = arith.constant 0 : index
    %0 = vector.load %arg1[%c0, %c0_0] : memref<2x256xf32, #tpu.memory_space<vmem>>, vector<2x256xf32>
    %c0_1 = arith.constant 0 : index
    %c0_2 = arith.constant 0 : index
    %1 = vector.load %arg2[%c0_1, %c0_2] : memref<128x256xf32, #tpu.memory_space<vmem>>, vector<128x256xf32>
    %cst = arith.constant dense<0.000000e+00> : vector<2x128xf32>
    %2 = tpu.matmul %0, %1, %cst {dimension_numbers = #tpu.dot_dimension_numbers<[1], [1], [0], [0], [0, 0, 1, 0], [], []>, precision = #tpu.contract_precision<fp32>} : vector<2x256xf32>, vector<128x256xf32>, vector<2x128xf32> -> vector<2x128xf32>
    %c0_3 = arith.constant 0 : index
    %c0_4 = arith.constant 0 : index
    %3 = vector.load %arg3[%c0_3, %c0_4] : memref<1x128xf32, #tpu.memory_space<vmem>>, vector<1x128xf32>
    %cst_5 = arith.constant 2.000000e+00 : f32
    %4 = vector.broadcast %cst_5 : f32 to vector<2x128xf32>
    %5 = arith.mulf %4, %2 : vector<2x128xf32>
    %6 = vector.broadcast %3 : vector<1x128xf32> to vector<2x128xf32>
    %7 = arith.subf %6, %5 : vector<2x128xf32>
    %8 = tpu.reduce_index %7 {axis = 1 : i32, kind = #tpu.reduction_kind<arg_min>} : vector<2x128xf32> -> vector<2xi32>
    %9 = vector.shape_cast %8 : vector<2xi32> to vector<2x1xi32>
    %c0_6 = arith.constant 0 : index
    %c0_7 = arith.constant 0 : index
    %10 = vector.load %arg4[%c0_6, %c0_7] : memref<2x1xi32, #tpu.memory_space<vmem>>, vector<2x1xi32>
    tpu.vector_store %arg4[%c0_6, %c0_7], %9 {strides = array<i32>} : memref<2x1xi32, #tpu.memory_space<vmem>>, vector<2x1xi32>,
    %11 = arith.mulf %0, %0 : vector<2x256xf32>
    %cst_8 = arith.constant dense<0.000000e+00> : vector<2xf32>
    %12 = vector.multi_reduction <add>, %11, %cst_8 [1] : vector<2x256xf32> to vector<2xf32>
    %13 = vector.shape_cast %12 : vector<2xf32> to vector<2x1xf32>
    %cst_9 = arith.constant dense<0x7F800000> : vector<2xf32>
    %14 = vector.multi_reduction <minimumf>, %7, %cst_9 [1] : vector<2x128xf32> to vector<2xf32>
    %15 = vector.shape_cast %14 : vector<2xf32> to vector<2x1xf32>
    %16 = arith.addf %13, %15 : vector<2x1xf32>
    %c0_10 = arith.constant 0 : index
    %c0_11 = arith.constant 0 : index
    %17 = vector.load %arg5[%c0_10, %c0_11] : memref<2x1xf32, #tpu.memory_space<vmem>>, vector<2x1xf32>
    tpu.vector_store %arg5[%c0_10, %c0_11], %16 {strides = array<i32>} : memref<2x1xf32, #tpu.memory_space<vmem>>, vector<2x1xf32>,
    return
  }
  func.func @transform_0(%arg0: i32) -> (i32, i32) {
    %c0_i32 = arith.constant 0 : i32
    %c0_i32_0 = arith.constant 0 : i32
    return %arg0, %c0_i32 : i32, i32
  }
  func.func @transform_1(%arg0: i32) -> (i32, i32) {
    %c0_i32 = arith.constant 0 : i32
    %c0_i32_0 = arith.constant 0 : i32
    %c0_i32_1 = arith.constant 0 : i32
    return %c0_i32, %c0_i32_0 : i32, i32
  }
  func.func @transform_2(%arg0: i32) -> (i32, i32) {
    %c0_i32 = arith.constant 0 : i32
    %c0_i32_0 = arith.constant 0 : i32
    %c0_i32_1 = arith.constant 0 : i32
    return %c0_i32, %c0_i32_0 : i32, i32
  }
  func.func @transform_3(%arg0: i32) -> (i32, i32) {
    %c0_i32 = arith.constant 0 : i32
    %c0_i32_0 = arith.constant 0 : i32
    return %arg0, %c0_i32 : i32, i32
  }
  func.func @transform_4(%arg0: i32) -> (i32, i32) {
    %c0_i32 = arith.constant 0 : i32
    %c0_i32_0 = arith.constant 0 : i32
    return %arg0, %c0_i32 : i32, i32
  }
}

module attributes {stable_mosaic.version = 11 : i64} {
  func.func @_vq_kernel(%arg0: i32, %arg1: memref<2x256xf32, #tpu.memory_space<vmem>>, %arg2: memref<128x256xf32, #tpu.memory_space<vmem>>, %arg3: memref<1x128xf32, #tpu.memory_space<vmem>>, %arg4: memref<2x1xi32, #tpu.memory_space<vmem>>, %arg5: memref<2x1xf32, #tpu.memory_space<vmem>>) attributes {dimension_semantics = [#tpu.dimension_semantics<parallel>], iteration_bounds = array<i64: 1>, scalar_prefetch = 0 : i64, scratch_operands = 0 : i64, tpu.core_type = #tpu.core_type<tc>, window_params = [{transform_indices = @transform_0, window_bounds = array<i64: 2, 256>}, {pipeline_mode = #tpu.pipeline_mode<synchronous>, transform_indices = @transform_1, window_bounds = array<i64: 128, 256>}, {pipeline_mode = #tpu.pipeline_mode<synchronous>, transform_indices = @transform_2, window_bounds = array<i64: 1, 128>}, {transform_indices = @transform_3, window_bounds = array<i64: 2, 1>}, {transform_indices = @transform_4, window_bounds = array<i64: 2, 1>}]} {
    %c0 = arith.constant 0 : index
    %c0_0 = arith.constant 0 : index
    %0 = vector.load %arg1[%c0, %c0_0] : memref<2x256xf32, #tpu.memory_space<vmem>>, vector<2x256xf32>
    %c0_1 = arith.constant 0 : index
    %c0_2 = arith.constant 0 : index
    %1 = vector.load %arg2[%c0_1, %c0_2] : memref<128x256xf32, #tpu.memory_space<vmem>>, vector<128x256xf32>
    %cst = arith.constant dense<0.000000e+00> : vector<2x128xf32>
    %2 = tpu.matmul %0, %1, %cst {dimension_numbers = #tpu.dot_dimension_numbers<[1], [1], [0], [0], [0, 0, 1, 0], [], []>, precision = #tpu.contract_precision<fp32>} : vector<2x256xf32>, vector<128x256xf32>, vector<2x128xf32> -> vector<2x128xf32>
    %c0_3 = arith.constant 0 : index
    %c0_4 = arith.constant 0 : index
    %3 = vector.load %arg3[%c0_3, %c0_4] : memref<1x128xf32, #tpu.memory_space<vmem>>, vector<1x128xf32>
    %cst_5 = arith.constant 2.000000e+00 : f32
    %4 = vector.broadcast %cst_5 : f32 to vector<2x128xf32>
    %5 = arith.mulf %4, %2 : vector<2x128xf32>
    %6 = vector.broadcast %3 : vector<1x128xf32> to vector<2x128xf32>
    %7 = arith.subf %6, %5 : vector<2x128xf32>
    %8 = tpu.reduce_index %7 {axis = 1 : i32, kind = #tpu.reduction_kind<arg_min>} : vector<2x128xf32> -> vector<2xi32>
    %9 = vector.shape_cast %8 : vector<2xi32> to vector<2x1xi32>
    %c0_6 = arith.constant 0 : index
    %c0_7 = arith.constant 0 : index
    %10 = vector.load %arg4[%c0_6, %c0_7] : memref<2x1xi32, #tpu.memory_space<vmem>>, vector<2x1xi32>
    tpu.vector_store %arg4[%c0_6, %c0_7], %9 {strides = array<i32>} : memref<2x1xi32, #tpu.memory_space<vmem>>, vector<2x1xi32>,
    %11 = arith.mulf %0, %0 : vector<2x256xf32>
    %cst_8 = arith.constant dense<0.000000e+00> : vector<2xf32>
    %12 = vector.multi_reduction <add>, %11, %cst_8 [1] : vector<2x256xf32> to vector<2xf32>
    %13 = vector.shape_cast %12 : vector<2xf32> to vector<2x1xf32>
    %cst_9 = arith.constant dense<0x7F800000> : vector<2xf32>
    %14 = vector.multi_reduction <minimumf>, %7, %cst_9 [1] : vector<2x128xf32> to vector<2xf32>
    %15 = vector.shape_cast %14 : vector<2xf32> to vector<2x1xf32>
    %16 = arith.addf %13, %15 : vector<2x1xf32>
    %c0_10 = arith.constant 0 : index
    %c0_11 = arith.constant 0 : index
    %17 = vector.load %arg5[%c0_10, %c0_11] : memref<2x1xf32, #tpu.memory_space<vmem>>, vector<2x1xf32>
    tpu.vector_store %arg5[%c0_10, %c0_11], %16 {strides = array<i32>} : memref<2x1xf32, #tpu.memory_space<vmem>>, vector<2x1xf32>,
    return
  }
  func.func @transform_0(%arg0: i32) -> (i32, i32) {
    %c0_i32 = arith.constant 0 : i32
    %c0_i32_0 = arith.constant 0 : i32
    return %arg0, %c0_i32 : i32, i32
  }
  func.func @transform_1(%arg0: i32) -> (i32, i32) {
    %c0_i32 = arith.constant 0 : i32
    %c0_i32_0 = arith.constant 0 : i32
    %c0_i32_1 = arith.constant 0 : i32
    return %c0_i32, %c0_i32_0 : i32, i32
  }
  func.func @transform_2(%arg0: i32) -> (i32, i32) {
    %c0_i32 = arith.constant 0 : i32
    %c0_i32_0 = arith.constant 0 : i32
    %c0_i32_1 = arith.constant 0 : i32
    return %c0_i32, %c0_i32_0 : i32, i32
  }
  func.func @transform_3(%arg0: i32) -> (i32, i32) {
    %c0_i32 = arith.constant 0 : i32
    %c0_i32_0 = arith.constant 0 : i32
    return %arg0, %c0_i32 : i32, i32
  }
  func.func @transform_4(%arg0: i32) -> (i32, i32) {
    %c0_i32 = arith.constant 0 : i32
    %c0_i32_0 = arith.constant 0 : i32
    return %arg0, %c0_i32 : i32, i32
  }
}

</mosaic_0001>

<bundles_post_ra>
// kernel: tpu_custom_call.1
= control target key start
LH: loop header
LB: loop body
LE: loop exit
PB: predicated region body
PF: predicated region fallthrough
CT: control target
= control target key end

     0   :  { %10 = vsyncpa [#allocation3], 0  ;;  %s1788_s0 = inlined_call_operand.hbm [shape: f32[2,256], index: 0, kind: input, shape index: {}]   ;;  %s1789_s1 = inlined_call_operand.hbm [shape: f32[128,256], index: 1, kind: input, shape index: {}]   ;;  %s1790_s2 = inlined_call_operand.vmem [shape: f32[1,128], index: 2, kind: input, shape index: {}]   ;;  %s1791_s3 = inlined_call_operand.vmem [shape: s32[2,1], index: 3, kind: output, shape index: {0}]   ;;  %s1792_s4 = inlined_call_operand.vmem [shape: f32[2,1], index: 4, kind: output, shape index: {1}]  }
   0x1   :  { %11 = vsyncpa [#allocation5], 0  ;;  %s1249_s15 = smov [#allocation2]   ;;  %s1250_s17 = smov [#allocation4]  }
   0x2   :  { %s18_s16 = sshll.u32 %s1249_s15, 4  ;;  %s27_s18 = sshll.u32 %s1250_s17, 4  ;;  %s19_s16 = int_to_ptr.vmem [resolvable:$true] %s18_s16  ;;  %s1279_s18 = int_to_ptr.vmem [resolvable:$true] %s27_s18 }
   0x3   :  { %s1201_s21 = scalar_lea.hbm %s1788_s0, 64 }
   0x4   :  { %p1202_p0 = scmp.ne.s32.totalorder %s1788_s0, %s1201_s21  ;;  %p1205_p1 = scmp.lt.u32.totalorder %s1201_s21, %s1788_s0 }
   0x6   :  { %p1207_p2 = pnand %p1205_p1, %p1202_p0 }
   0x8   :  { %1210 = shalt.err (!%p1207_p2)
}
   0x9   :  { %s1211_s26 = scalar_lea.vmem %s19_s16, 64  ;;  %p1216_p4 = scmp.lt.s32.totalorder %s19_s16, %s19_s16 }
   0xa   :  { %p1212_p3 = scmp.ne.s32.totalorder %s19_s16, %s1211_s26  ;;  %p1217_p5 = scmp.lt.s32.totalorder %s1211_s26, %s1211_s26 }
   0xc   :  { %p1218_p6 = por %p1217_p5, %p1216_p4 }
   0xe   :  { %p1219_p7 = pnand %p1218_p6, %p1212_p3 }
  0x10   :  { %1222 = shalt.err (!%p1219_p7)
}
  0x11   :  { %21 = dma.hbm_to_vmem [thread:$0]  %s1788_s0, 64, %s19_s16, [#allocation3]  }
  0x12   :  { %s1223_s5 = scalar_lea.hbm %s1789_s1, 4096 }
  0x13   :  { %p1224_p8 = scmp.ne.s32.totalorder %s1789_s1, %s1223_s5  ;;  %p1227_p9 = scmp.lt.u32.totalorder %s1223_s5, %s1789_s1 }
  0x15   :  { %p1229_p10 = pnand %p1227_p9, %p1224_p8 }
  0x17   :  { %1232 = shalt.err (!%p1229_p10)
}
  0x18   :  { %s1233_s10 = scalar_lea.vmem %s1279_s18, 4096  ;;  %p1238_p12 = scmp.lt.s32.totalorder %s1279_s18, %s1279_s18 }
  0x19   :  { %p1234_p11 = scmp.ne.s32.totalorder %s1279_s18, %s1233_s10  ;;  %p1239_p13 = scmp.lt.s32.totalorder %s1233_s10, %s1233_s10 }
  0x1b   :  { %p1240_p0 = por %p1239_p13, %p1238_p12 }
  0x1d   :  { %p1241_p1 = pnand %p1240_p0, %p1234_p11 }
  0x1f   :  { %1244 = shalt.err (!%p1241_p1)
}
  0x20   :  { %s1251_s0 = smov 256   ;;  %s1252_s11 = smov 16  }
  0x21   :  { %33 = dma.hbm_to_vmem [thread:$0]  %s1789_s1, 4096, %s1279_s18, [#allocation5], %s1251_s0, %s1251_s0, %s1252_s11  }
  0x22   :  { %1245 = dma.done.wait [#allocation3], 64  }
  0x23   :  { %1246 = vsyncadd [#allocation3], 4294967232 }
  0x24   :  { %1247 = dma.done.wait [#allocation5], 4096  }
  0x25   :  { %1248 = vsyncadd [#allocation5], 4294963200  ;;  %v1310_v0 = vld [vmem:[#allocation4 + $0x8] sm:$0xff]  ;;  %v1312_v1 = vld [vmem:[#allocation4 + $0x18] sm:$0xff]  ;;  %v1253_v23 = vmov 1983009808   ;;  %v79_v25 = vlaneseq }
  0x26   :  { %v1314_v2 = vld [vmem:[#allocation4] sm:$0xff]  ;;  %v86_v3 = vand.u32 4294901760, %v1310_v0  ;;  %v90_v4 = vand.u32 4294901760, %v1312_v1  ;;  %v1318_v5 = vld [vmem:[#allocation4 + $0x10] sm:$0xff]  ;;  %v1321_v7 = vld [vmem:[#allocation4 + $0x28] sm:$0xff]  ;;  %v77_v24 = vunpack.c.l.s4 %v1253_v23  ;;  %vm957_vm0 = vcmask 1041408  }
  0x27   :  { %v88_v6 = vand.u32 4294901760, %v1314_v2  ;;  %v1323_v8 = vld [vmem:[#allocation4 + $0x38] sm:$0xff]  ;;  %v92_v9 = vand.u32 4294901760, %v1318_v5  ;;  %v94_v10 = vand.u32 4294901760, %v1321_v7  ;;  %v1334_v13 = vld [vmem:[#allocation4 + $0x20] sm:$0xff]  ;;  %v1336_v14 = vld [vmem:[#allocation4 + $0x30] sm:$0xff] }
  0x28   :  { %v98_v11 = vand.u32 4294901760, %v1323_v8  ;;  %v1332_v12 = vpack.c.bf16 %v90_v4, %v86_v3  ;;  %v1350_v17 = vld [vmem:[#allocation4 + $0x48] sm:$0xff]  ;;  %v1352_v18 = vld [vmem:[#allocation4 + $0x58] sm:$0xff]  ;;  %v1800_v19 = vand.u32 4294901760, %v1334_v13  ;;  %v1799_v20 = vand.u32 4294901760, %v1336_v14  ;;  %v1376_v28 = vld [vmem:[#allocation4 + $0x40] sm:$0xff] }
  0x29   :  { %v1342_v15 = vpack.c.bf16 %v92_v9, %v88_v6  ;;  %v1798_v21 = vand.u32 4294901760, %v1350_v17  ;;  %v1797_v22 = vand.u32 4294901760, %v1352_v18  ;;  %v1378_v29 = vld [vmem:[#allocation4 + $0x50] sm:$0xff]  ;;  %v1380_v30 = vld [vmem:[#allocation4 + $0x68] sm:$0xff]  ;;  %v1382_v31 = vld [vmem:[#allocation4 + $0x78] sm:$0xff]  ;;  %v78_v32 = vunpack.c.0.s8 %v77_v24 }
  0x2a   :  { %v1348_v16 = vpack.c.bf16 %v98_v11, %v94_v10  ;;  %996 = vmatprep.subr.bf16.mxu1 %v1332_v12  ;;  %1092 = vmatprep.subr.bf16.mxu0 %v1332_v12  ;;  %v1368_v26 = vpack.c.bf16 %v1799_v20, %v1800_v19  ;;  %v80_v33 = vshrl.u32 %v79_v25, 7  ;;  %v1796_v34 = vand.u32 4294901760, %v1376_v28  ;;  %v1394_v39 = vld [vmem:[#allocation2] sm:$0xf]  ;;  %v1408_v42 = vld [vmem:[#allocation4 + $0x60] sm:$0xff]  ;;  %v1410_v43 = vld [vmem:[#allocation4 + $0x70] sm:$0xff] }
  0x2b   :  { %998 = vmatpush1.bf16.xpose.msra.mxu1 %v1342_v15  ;;  %1094 = vmatpush1.bf16.xpose.msra.mxu0 %v1342_v15  ;;  %v1374_v27 = vpack.c.bf16 %v1797_v22, %v1798_v21  ;;  %v1795_v35 = vand.u32 4294901760, %v1378_v29  ;;  %v1794_v36 = vand.u32 4294901760, %v1380_v30  ;;  %v1793_v37 = vand.u32 4294901760, %v1382_v31  ;;  %1820 = vst [vmem:[#allocation11_spill] sm:$0xff] %v1394_v39  ;;  %v1412_v44 = vld [vmem:[#allocation4 + $0x88] sm:$0xff]  ;;  %v1414_v45 = vld [vmem:[#allocation4 + $0x98] sm:$0xff] }
  0x2c   :  { %1000 = vmatprep.subr.bf16.mxu1 %v1348_v16  ;;  %1096 = vmatprep.subr.bf16.mxu0 %v1348_v16  ;;  %1817 = vst [vmem:[#allocation8_spill] sm:$0xff] %v1368_v26  ;;  %v1392_v38 = vsub.s32 %v78_v32, %v80_v33  ;;  %v112_v47 = vand.u32 4294901760, %v1408_v42  ;;  %v116_v48 = vand.u32 4294901760, %v1410_v43  ;;  %v118_v50 = vand.u32 4294901760, %v1412_v44  ;;  %v1439_v56 = vld [vmem:[#allocation4 + $0x80] sm:$0xff]  ;;  %v1441_v57 = vld [vmem:[#allocation4 + $0x90] sm:$0xff] }
  0x2d   :  { %1818 = vst [vmem:[#allocation9_spill] sm:$0xff] %v1374_v27  ;;  %v1400_v40 = vpack.c.bf16 %v1795_v35, %v1796_v34  ;;  %v1406_v41 = vpack.c.bf16 %v1793_v37, %v1794_v36  ;;  %v122_v51 = vand.u32 4294901760, %v1414_v45  ;;  %v1443_v58 = vld [vmem:[#allocation4 + $0xa8] sm:$0xff]  ;;  %v1445_v59 = vld [vmem:[#allocation4 + $0xb8] sm:$0xff]  ;;  %v120_v61 = vand.u32 4294901760, %v1439_v56  ;;  %v65_v37 = vld [vmem:[#allocation4 + $0xb0] sm:$0xff] }
  0x2e   :  { %1819 = vst [vmem:[#allocation10_spill] sm:$0xff] %v1392_v38  ;;  %v1418_v46 = vrot.slane %v1394_v39, %v1392_v38  ;;  %v1432_v53 = vpack.c.bf16 %v116_v48, %v112_v47  ;;  %v124_v62 = vand.u32 4294901760, %v1441_v57  ;;  %v126_v23 = vand.u32 4294901760, %v1443_v58  ;;  %v68_v36 = vld [vmem:[#allocation4 + $0xc8] sm:$0xff]  ;;  %v70_v35 = vld [vmem:[#allocation4 + $0xd8] sm:$0xff] }
  0x2f   :  { %1821 = vst [vmem:[#allocation12_spill] sm:$0xff] %v1400_v40  ;;  %1822 = vst [vmem:[#allocation13_spill] sm:$0xff] %v1406_v41  ;;  %v1437_v55 = vpack.c.bf16 %v122_v51, %v118_v50  ;;  %v130_v24 = vand.u32 4294901760, %v1445_v59  ;;  %v132_v22 = vand.u32 4294901760, %v65_v37  ;;  %v1473_v21 = vsub.f32 %v1312_v1, %v90_v4 }
  0x30   :  { %v83_v49 = vcombine.high %v1418_v46, %v1418_v46  ;;  %1823 = vst [vmem:[#allocation14_spill] sm:$0xff] %v1432_v53  ;;  %v1457_v32 = vpack.c.bf16 %v124_v62, %v120_v61  ;;  %v1478_v20 = vsub.f32 %v1314_v2, %v88_v6  ;;  %v1483_v19 = vsub.f32 %v1318_v5, %v92_v9 }
  0x31   :  { %1824 = vst [vmem:[#allocation15_spill] sm:$0xff] %v1437_v55  ;;  %v1459_v33 = vpack.c.bf16 %v130_v24, %v126_v23  ;;  %v1493_v1 = vsub.f32 %v1323_v8, %v98_v11  ;;  %v1829_v5 = vand.u32 4294901760, %v1336_v14  ;;  %v1831_v8 = vand.u32 4294901760, %v1352_v18 }
  0x32   :  { %v1430_v52 = vand.u32 4294901760, %v83_v49  ;;  %1825 = vst [vmem:[#allocation16_spill] sm:$0xff] %v1457_v32  ;;  %v1833_v38 = vand.u32 4294901760, %v1376_v28  ;;  %vm961_vm1 = vcmask 1024  }
  0x33   :  { %1002 = vmatpush1.bf16.xpose.msra.mxu1 %v1368_v26  ;;  %1098 = vmatpush1.bf16.xpose.msra.mxu0 %v1368_v26  ;;  %1826 = vst [vmem:[#allocation17_spill] sm:$0xff] %v1459_v33  ;;  %v1505_v6 = vsub.f32 %v1336_v14, %v1829_v5  ;;  %v1834_v14 = vand.u32 4294901760, %v1378_v29 }
  0x34   :  { %1004 = vmatprep.subr.bf16.mxu1 %v1374_v27  ;;  %1100 = vmatprep.subr.bf16.mxu0 %v1374_v27  ;;  %v1435_v54 = vsub.f32 %v83_v49, %v1430_v52  ;;  %v63_v49 = vld [vmem:[#allocation4 + $0xa0] sm:$0xff]  ;;  %v1522_v39 = vsub.f32 %v1376_v28, %v1833_v38  ;;  %v1540_v28 = vsub.f32 %v1408_v42, %v112_v47 }
  0x35   :  { %v128_v34 = vand.u32 4294901760, %v63_v49  ;;  %v1527_v5 = vsub.f32 %v1378_v29, %v1834_v14  ;;  %v1543_v38 = vsub.f32 %v1410_v43, %v116_v48  ;;  %v212_v14 = vand.u32 4294901760, %v1473_v21  ;;  %v71_v47 = vld [vmem:[#allocation4 + $0xe0] sm:$0xff] }
  0x36   :  { %v184_v60 = vand.u32 4294901760, %v1435_v54  ;;  %v1556_v43 = vsub.f32 %v1439_v56, %v120_v61  ;;  %v1559_v48 = vsub.f32 %v1441_v57, %v124_v62  ;;  %v1572_v56 = vand.u32 4294901760, %v1418_v46 }
  0x37   :  { %v1500_v4 = vpack.c.bf16 %v132_v22, %v128_v34  ;;  %v144_v61 = vand.u32 4294901760, %v71_v47 }
  0x38   :  { %v185_v63 = vsub.f32 %v1435_v54, %v184_v60  ;;  %667 = vmatprep.mubr.f32.mxu0 %v184_v60  ;;  %v134_v60 = vand.u32 4294901760, %v68_v36 }
  0x39   :  { %1828 = vst [vmem:[#allocation18_spill] sm:$0xff] %v1500_v4 }
  0x3a   :  { %v186_v25 = vand.u32 4294901760, %v185_v63  ;;  %v138_v63 = vand.u32 4294901760, %v70_v35 }
  0x3b   :  { %1006 = vmatpush1.bf16.xpose.msra.mxu1 %v1400_v40  ;;  %1102 = vmatpush1.bf16.xpose.msra.mxu0 %v1400_v40 }
  0x3c   :  { %1008 = vmatprep.subr.bf16.mxu1 %v1406_v41  ;;  %1104 = vmatprep.subr.bf16.mxu0 %v1406_v41  ;;  %v1517_v11 = vpack.c.bf16 %v138_v63, %v134_v60 }
  0x3d   :  { %187 = vmatprep.mubr.f32.mxu1 %v186_v25  ;;  %v1468_v25 = vsub.f32 %v1310_v0, %v86_v3  ;;  %v1488_v0 = vsub.f32 %v1321_v7, %v94_v10  ;;  %v1827_v3 = vand.u32 4294901760, %v1334_v13  ;;  %v1830_v7 = vand.u32 4294901760, %v1350_v17 }
  0x3e   :  { %v1515_v10 = vsub.f32 %v1352_v18, %v1831_v8  ;;  %1832 = vst [vmem:[#allocation19_spill] sm:$0xff] %v1517_v11  ;;  %v1836_v18 = vand.u32 4294901760, %v1382_v31 }
  0x3f   :  { %v1498_v2 = vsub.f32 %v1334_v13, %v1827_v3  ;;  %v1510_v9 = vsub.f32 %v1350_v17, %v1830_v7  ;;  %v67_v13 = vld [vmem:[#allocation4 + $0xc0] sm:$0xff]  ;;  %v69_v3 = vld [vmem:[#allocation4 + $0xd0] sm:$0xff]  ;;  %v1835_v17 = vand.u32 4294901760, %v1380_v30  ;;  %v200_v29 = vand.u32 4294901760, %v1468_v25 }
  0x40   :  { %v1537_v8 = vsub.f32 %v1382_v31, %v1836_v18  ;;  %v136_v31 = vand.u32 4294901760, %v67_v13  ;;  %v140_v42 = vand.u32 4294901760, %v69_v3  ;;  %v73_v18 = vld [vmem:[#allocation4 + $0xf0] sm:$0xff] }
  0x41   :  { %v1532_v7 = vsub.f32 %v1380_v30, %v1835_v17  ;;  %v1548_v30 = vsub.f32 %v1412_v44, %v118_v50  ;;  %v1551_v17 = vsub.f32 %v1414_v45, %v122_v51  ;;  %v1564_v50 = vsub.f32 %v1443_v58, %v126_v23 }
  0x42   :  { %v1567_v51 = vsub.f32 %v1445_v59, %v130_v24  ;;  %v148_v57 = vand.u32 4294901760, %v73_v18  ;;  %v201_v62 = vsub.f32 %v1468_v25, %v200_v29  ;;  %v1580_v58 = vsub.f32 %v70_v35, %v138_v63 }
  0x43   :  { %1010 = vmatpush1.bf16.xpose.msra.mxu1 %v1432_v53  ;;  %1106 = vmatpush1.bf16.xpose.msra.mxu0 %v1432_v53  ;;  %v1578_v53 = vsub.f32 %v68_v36, %v134_v60  ;;  %v1582_v23 = vpack.c.bf16 %v140_v42, %v136_v31  ;;  %v1584_v59 = vsub.f32 %v67_v13, %v136_v31  ;;  %v206_v24 = vand.u32 4294901760, %v1478_v20 }
  0x44   :  { %1012 = vmatprep.subr.bf16.mxu1 %v1437_v55  ;;  %1108 = vmatprep.subr.bf16.mxu0 %v1437_v55  ;;  %v213_v55 = vsub.f32 %v1473_v21, %v212_v14  ;;  %v1590_v41 = vsub.f32 %v69_v3, %v140_v42  ;;  %v224_v35 = vand.u32 4294901760, %v1488_v0  ;;  %v202_v60 = vand.u32 4294901760, %v201_v62 }
  0x45   :  { %1837 = vst [vmem:[#allocation20_spill] sm:$0xff] %v1582_v23  ;;  %v1605_v13 = vsub.f32 %v71_v47, %v144_v61  ;;  %v1123_v3 = vpack.c.bf16 %v212_v14, %v200_v29  ;;  %v230_v14 = vand.u32 4294901760, %v1498_v2  ;;  %v248_v29 = vand.u32 4294901760, %v1510_v9 }
  0x46   :  { %v214_v63 = vand.u32 4294901760, %v213_v55  ;;  %v225_v47 = vsub.f32 %v1488_v0, %v224_v35 }
  0x47   :  { %v231_v27 = vsub.f32 %v1498_v2, %v230_v14  ;;  %v249_v26 = vsub.f32 %v1510_v9, %v248_v29 }
  0x48   :  { %v226_v62 = vand.u32 4294901760, %v225_v47 }
  0x4b   :  { %1014 = vmatpush1.bf16.xpose.msra.mxu1 %v1457_v32  ;;  %1110 = vmatpush1.bf16.xpose.msra.mxu0 %v1457_v32  ;;  %v74_v32 = vld [vmem:[#allocation4 + $0xf8] sm:$0xff] }
  0x4c   :  { %1016 = vmatprep.subr.bf16.mxu1 %v1459_v33  ;;  %1112 = vmatprep.subr.bf16.mxu0 %v1459_v33  ;;  %v72_v33 = vld [vmem:[#allocation4 + $0xe8] sm:$0xff]  ;;  %v146_v45 = vand.u32 4294901760, %v74_v32 }
  0x4d   :  { %v142_v44 = vand.u32 4294901760, %v72_v33 }
  0x4e   :  { %v1599_v36 = vsub.f32 %v74_v32, %v146_v45  ;;  %v207_v32 = vsub.f32 %v1478_v20, %v206_v24 }
  0x4f   :  { %v1592_v40 = vsub.f32 %v72_v33, %v142_v44  ;;  %v1607_v33 = vsub.f32 %v73_v18, %v148_v57  ;;  %v1027_v18 = vpack.c.bf16 %v214_v63, %v202_v60  ;;  %v260_v60 = vand.u32 4294901760, %v1515_v10 }
  0x53   :  { %1018 = vmatpush1.bf16.xpose.msra.mxu1 %v1500_v4  ;;  %1114 = vmatpush1.bf16.xpose.msra.mxu0 %v1500_v4  ;;  %v1569_v4 = vsub.f32 %v63_v49, %v128_v34  ;;  %v1586_v34 = vpack.c.bf16 %v146_v45, %v142_v44  ;;  %v218_v49 = vand.u32 4294901760, %v1483_v19  ;;  %v208_v45 = vand.u32 4294901760, %v207_v32 }
  0x54   :  { %1020 = vmatprep.subr.bf16.mxu1 %v1517_v11  ;;  %1116 = vmatprep.subr.bf16.mxu0 %v1517_v11  ;;  %v1576_v11 = vsub.f32 %v65_v37, %v132_v22  ;;  %v1596_v22 = vsub.f32 %v1418_v46, %v1572_v56  ;;  %v1601_v37 = vpack.c.bf16 %v148_v57, %v144_v61  ;;  %v236_v46 = vand.u32 4294901760, %v1493_v1 }
  0x55   :  { %1838 = vst [vmem:[#allocation21_spill] sm:$0xff] %v1586_v34  ;;  %v219_v31 = vsub.f32 %v1483_v19, %v218_v49  ;;  %v242_v44 = vand.u32 4294901760, %v1505_v6 }
  0x56   :  { %1839 = vst [vmem:[#allocation22_spill] sm:$0xff] %v1596_v22  ;;  %1840 = vst [vmem:[#allocation23_spill] sm:$0xff] %v1601_v37  ;;  %v190_v42 = vand.u32 4294901760, %v1596_v22  ;;  %v237_v57 = vsub.f32 %v1493_v1, %v236_v46 }
  0x57   :  { %v220_v61 = vand.u32 4294901760, %v219_v31  ;;  %v243_v32 = vsub.f32 %v1505_v6, %v242_v44 }
  0x58   :  { %v191_v63 = vsub.f32 %v1596_v22, %v190_v42  ;;  %v238_v55 = vand.u32 4294901760, %v237_v57  ;;  %v254_v57 = vand.u32 4294901760, %v1522_v39 }
  0x59   :  { %v1029_v22 = vpack.c.bf16 %v220_v61, %v208_v45  ;;  %v244_v47 = vand.u32 4294901760, %v243_v32  ;;  %v290_v32 = vand.u32 4294901760, %v1543_v38 }
  0x5a   :  { %v1031_v31 = vpack.c.bf16 %v238_v55, %v226_v62 }
  0x5b   :  { %1022 = vmatpush1.bf16.xpose.msra.mxu1 %v1582_v23  ;;  %1118 = vmatpush1.bf16.xpose.msra.mxu0 %v1582_v23  ;;  %v1125_v23 = vpack.c.bf16 %v218_v49, %v206_v24  ;;  %v266_v24 = vand.u32 4294901760, %v1527_v5  ;;  %v250_v49 = vand.u32 4294901760, %v249_v26 }
  0x5c   :  { %1024 = vmatprep.subr.bf16.mxu1 %v1586_v34  ;;  %1120 = vmatprep.subr.bf16.mxu0 %v1586_v34  ;;  %v192_v34 = vand.u32 4294901760, %v191_v63  ;;  %v278_v63 = vand.u32 4294901760, %v1540_v28 }
  0x63   :  { %1026 = vmatpush1.bf16.xpose.msra.mxu1 %v1601_v37  ;;  %1122 = vmatpush1.bf16.xpose.msra.mxu0 %v1601_v37  ;;  %v1127_v37 = vpack.c.bf16 %v236_v46, %v224_v35  ;;  %v272_v35 = vand.u32 4294901760, %v1532_v7  ;;  %v284_v46 = vand.u32 4294901760, %v1537_v8 }
  0x64   :  { %1028 = vmatprep.subr.bf16.mxu1 %v1027_v18  ;;  %1124 = vmatprep.subr.bf16.mxu0 %v1123_v3  ;;  %v261_v18 = vsub.f32 %v1515_v10, %v260_v60  ;;  %v232_v3 = vand.u32 4294901760, %v231_v27  ;;  %v255_v27 = vsub.f32 %v1522_v39, %v254_v57 }
  0x65   :  { %v285_v26 = vsub.f32 %v1537_v8, %v284_v46 }
  0x66   :  { %v262_v45 = vand.u32 4294901760, %v261_v18  ;;  %v256_v61 = vand.u32 4294901760, %v255_v27  ;;  %v1133_v18 = vpack.c.bf16 %v266_v24, %v254_v57 }
  0x68   :  { %v1035_v55 = vpack.c.bf16 %v262_v45, %v250_v49  ;;  %v1135_v45 = vpack.c.bf16 %v284_v46, %v272_v35 }
  0x6a   :  { %193 = vmatmul.mubr.f32.vlgmr.msra.gmra.mrb[0].mxu1 %v192_v34  ;;  %671 = vmatmul.mubr.f32.vlgmr.msra.gmra.mrb[0].mxu0 %v190_v42  ;;  %v1033_v34 = vpack.c.bf16 %v244_v47, %v232_v3  ;;  %v1131_v42 = vpack.c.bf16 %v260_v60, %v248_v29  ;;  %v308_v29 = vand.u32 4294901760, %v1551_v17  ;;  %v279_v3 = vsub.f32 %v1540_v28, %v278_v63 }
  0x6b   :  { %1030 = vmatpush1.bf16.xpose.msra.mxu1 %v1029_v22  ;;  %1126 = vmatpush1.bf16.xpose.msra.mxu0 %v1125_v23  ;;  %v1129_v23 = vpack.c.bf16 %v242_v44, %v230_v14  ;;  %v267_v22 = vsub.f32 %v1527_v5, %v266_v24  ;;  %v286_v44 = vand.u32 4294901760, %v285_v26  ;;  %v291_v47 = vsub.f32 %v1543_v38, %v290_v32 }
  0x6c   :  { %1032 = vmatprep.subr.bf16.mxu1 %v1031_v31  ;;  %1128 = vmatprep.subr.bf16.mxu0 %v1127_v37  ;;  %v273_v37 = vsub.f32 %v1532_v7, %v272_v35  ;;  %v296_v31 = vand.u32 4294901760, %v1548_v30  ;;  %v280_v27 = vand.u32 4294901760, %v279_v3  ;;  %v332_v35 = vand.u32 4294901760, %v1567_v51 }
  0x6d   :  { %423 = vmatprep.mubr.f32.mxu1 %v1430_v52  ;;  %837 = vmatprep.mubr.f32.mxu0 %v1430_v52  ;;  %v268_v62 = vand.u32 4294901760, %v267_v22  ;;  %v292_v22 = vand.u32 4294901760, %v291_v47  ;;  %v1137_v26 = vpack.c.bf16 %v290_v32, %v278_v63 }
  0x6e   :  { %v274_v14 = vand.u32 4294901760, %v273_v37  ;;  %v320_v37 = vand.u32 4294901760, %v1564_v50 }
  0x6f   :  { %v1037_v60 = vpack.c.bf16 %v268_v62, %v256_v61  ;;  %v1041_v46 = vpack.c.bf16 %v292_v22, %v280_v27 }
  0x70   :  { %v1039_v49 = vpack.c.bf16 %v286_v44, %v274_v14  ;;  %v1139_v44 = vpack.c.bf16 %v308_v29, %v296_v31 }
  0x73   :  { %1034 = vmatpush1.bf16.xpose.msra.mxu1 %v1033_v34  ;;  %1130 = vmatpush1.bf16.xpose.msra.mxu0 %v1129_v23  ;;  %v297_v34 = vsub.f32 %v1548_v30, %v296_v31  ;;  %v309_v23 = vsub.f32 %v1551_v17, %v308_v29  ;;  %v356_v31 = vand.u32 4294901760, %v1580_v58 }
  0x74   :  { %1036 = vmatprep.subr.bf16.mxu1 %v1035_v55  ;;  %1132 = vmatprep.subr.bf16.mxu0 %v1131_v42  ;;  %v302_v55 = vand.u32 4294901760, %v1556_v43  ;;  %v314_v42 = vand.u32 4294901760, %v1559_v48 }
  0x75   :  { %v298_v57 = vand.u32 4294901760, %v297_v34  ;;  %v310_v24 = vand.u32 4294901760, %v309_v23  ;;  %v344_v34 = vand.u32 4294901760, %v1578_v53 }
  0x76   :  { %v303_v61 = vsub.f32 %v1556_v43, %v302_v55  ;;  %v315_v62 = vsub.f32 %v1559_v48, %v314_v42  ;;  %v1141_v23 = vpack.c.bf16 %v314_v42, %v302_v55 }
  0x77   :  { %v1043_v14 = vpack.c.bf16 %v310_v24, %v298_v57  ;;  %v1143_v24 = vpack.c.bf16 %v332_v35, %v320_v37 }
  0x78   :  { %v304_v3 = vand.u32 4294901760, %v303_v61  ;;  %v316_v47 = vand.u32 4294901760, %v315_v62 }
  0x7a   :  { %v1045_v29 = vpack.c.bf16 %v316_v47, %v304_v3 }
  0x7b   :  { %1038 = vmatpush1.bf16.xpose.msra.mxu1 %v1037_v60  ;;  %1134 = vmatpush1.bf16.xpose.msra.mxu0 %v1133_v18  ;;  %v321_v60 = vsub.f32 %v1564_v50, %v320_v37  ;;  %v333_v18 = vsub.f32 %v1567_v51, %v332_v35  ;;  %v380_v37 = vand.u32 4294901760, %v1599_v36 }
  0x7c   :  { %1040 = vmatprep.subr.bf16.mxu1 %v1039_v49  ;;  %1136 = vmatprep.subr.bf16.mxu0 %v1135_v45  ;;  %v326_v49 = vand.u32 4294901760, %v1569_v4  ;;  %v338_v45 = vand.u32 4294901760, %v1576_v11 }
  0x7d   :  { %v322_v63 = vand.u32 4294901760, %v321_v60  ;;  %v334_v32 = vand.u32 4294901760, %v333_v18  ;;  %v368_v60 = vand.u32 4294901760, %v1592_v40 }
  0x7e   :  { %v327_v27 = vsub.f32 %v1569_v4, %v326_v49  ;;  %v339_v22 = vsub.f32 %v1576_v11, %v338_v45  ;;  %v1145_v18 = vpack.c.bf16 %v338_v45, %v326_v49 }
  0x7f   :  { %v1047_v57 = vpack.c.bf16 %v334_v32, %v322_v63  ;;  %v1147_v32 = vpack.c.bf16 %v356_v31, %v344_v34 }
  0x80   :  { %v328_v61 = vand.u32 4294901760, %v327_v27  ;;  %v340_v62 = vand.u32 4294901760, %v339_v22 }
  0x82   :  { %v1049_v35 = vpack.c.bf16 %v340_v62, %v328_v61  ;;  %v1151_v62 = vpack.c.bf16 %v380_v37, %v368_v60 }
  0x83   :  { %1042 = vmatpush1.bf16.xpose.msra.mxu1 %v1041_v46  ;;  %1138 = vmatpush1.bf16.xpose.msra.mxu0 %v1137_v26  ;;  %v345_v46 = vsub.f32 %v1578_v53, %v344_v34  ;;  %v357_v26 = vsub.f32 %v1580_v58, %v356_v31 }
  0x84   :  { %1044 = vmatprep.subr.bf16.mxu1 %v1043_v14  ;;  %1140 = vmatprep.subr.bf16.mxu0 %v1139_v44  ;;  %v350_v14 = vand.u32 4294901760, %v1584_v59  ;;  %v362_v44 = vand.u32 4294901760, %v1590_v41 }
  0x85   :  { %v346_v55 = vand.u32 4294901760, %v345_v46  ;;  %v358_v42 = vand.u32 4294901760, %v357_v26 }
  0x86   :  { %v351_v3 = vsub.f32 %v1584_v59, %v350_v14  ;;  %v363_v47 = vsub.f32 %v1590_v41, %v362_v44  ;;  %v1149_v26 = vpack.c.bf16 %v362_v44, %v350_v14  ;;  %v1842_v14 = vpack.c.bf16 %v1483_v19, %v1478_v20 }
  0x87   :  { %v1051_v63 = vpack.c.bf16 %v358_v42, %v346_v55  ;;  %v1843_v44 = vpack.c.bf16 %v1493_v1, %v1488_v0  ;;  %v1846_v19 = vpack.c.bf16 %v1515_v10, %v1510_v9  ;;  %v1848_v20 = vpack.c.bf16 %v1527_v5, %v1522_v39  ;;  %v1853_v0 = vld [vmem:[#allocation14_spill] sm:$0xff]  ;;  %v1855_v39 = vld [vmem:[#allocation15_spill] sm:$0xff]  ;;  %v1859_v10 = vld [vmem:[#allocation17_spill] sm:$0xff] }
  0x88   :  { %v352_v27 = vand.u32 4294901760, %v351_v3  ;;  %v364_v22 = vand.u32 4294901760, %v363_v47  ;;  %v1841_v3 = vpack.c.bf16 %v1473_v21, %v1468_v25  ;;  %v1845_v21 = vld [vmem:[#allocation8_spill] sm:$0xff]  ;;  %v1852_v25 = vpack.c.bf16 %v1543_v38, %v1540_v28  ;;  %v1863_v28 = vld [vmem:[#allocation19_spill] sm:$0xff] }
  0x89   :  { %v1854_v1 = vpack.c.bf16 %v1551_v17, %v1548_v30  ;;  %v1858_v9 = vpack.c.bf16 %v1567_v51, %v1564_v50  ;;  %v1860_v5 = vpack.c.bf16 %v1576_v11, %v1569_v4  ;;  %v1864_v38 = vpack.c.bf16 %v1590_v41, %v1584_v59  ;;  %v1865_v30 = vld [vmem:[#allocation20_spill] sm:$0xff]  ;;  %v1867_v4 = vld [vmem:[#allocation21_spill] sm:$0xff]  ;;  %v1871_v41 = vld [vmem:[#allocation11_spill] sm:$0xff] }
  0x8a   :  { %v1053_v46 = vpack.c.bf16 %v364_v22, %v352_v27  ;;  %v1866_v17 = vpack.c.bf16 %v1599_v36, %v1592_v40  ;;  %v1868_v11 = vpack.c.bf16 %v1607_v33, %v1605_v13  ;;  %v1872_v50 = vld [vmem:[#allocation10_spill] sm:$0xff] }
  0x8b   :  { %1046 = vmatpush1.bf16.xpose.msra.mxu1 %v1045_v29  ;;  %1142 = vmatpush1.bf16.xpose.msra.mxu0 %v1141_v23  ;;  %v369_v29 = vsub.f32 %v1592_v40, %v368_v60  ;;  %v381_v23 = vsub.f32 %v1599_v36, %v380_v37 }
  0x8c   :  { %1048 = vmatprep.subr.bf16.mxu1 %v1047_v57  ;;  %1144 = vmatprep.subr.bf16.mxu0 %v1143_v24  ;;  %v374_v57 = vand.u32 4294901760, %v1605_v13  ;;  %v386_v24 = vand.u32 4294901760, %v1607_v33 }
  0x8d   :  { %v370_v49 = vand.u32 4294901760, %v369_v29  ;;  %v382_v45 = vand.u32 4294901760, %v381_v23 }
  0x8e   :  { %v375_v34 = vsub.f32 %v1605_v13, %v374_v57  ;;  %v387_v31 = vsub.f32 %v1607_v33, %v386_v24 }
  0x8f   :  { %v1055_v61 = vpack.c.bf16 %v382_v45, %v370_v49 }
  0x90   :  { %v376_v55 = vand.u32 4294901760, %v375_v34  ;;  %v388_v42 = vand.u32 4294901760, %v387_v31 }
  0x93   :  { %1050 = vmatpush1.bf16.xpose.msra.mxu1 %v1049_v35  ;;  %1146 = vmatpush1.bf16.xpose.msra.mxu0 %v1145_v18  ;;  %v1057_v35 = vpack.c.bf16 %v388_v42, %v376_v55  ;;  %v1153_v18 = vpack.c.bf16 %v386_v24, %v374_v57 }
  0x94   :  { %1052 = vmatprep.subr.bf16.mxu1 %v1051_v63  ;;  %1148 = vmatprep.subr.bf16.mxu0 %v1147_v32 }
  0x9b   :  { %1054 = vmatpush1.bf16.xpose.msra.mxu1 %v1053_v46  ;;  %1150 = vmatpush1.bf16.xpose.msra.mxu0 %v1149_v26 }
  0x9c   :  { %1056 = vmatprep.subr.bf16.mxu1 %v1055_v61  ;;  %1152 = vmatprep.subr.bf16.mxu0 %v1151_v62 }
  0xa3   :  { %1058 = vmatpush1.bf16.xpose.msra.mxu1 %v1057_v35  ;;  %1154 = vmatpush1.bf16.xpose.msra.mxu0 %v1153_v18 }
  0xa4   :  { %1060 = vmatprep.subr.bf16.mxu1 %v1841_v3  ;;  %1156 = vmatprep.subr.bf16.mxu0 %v1332_v12  ;;  %v1844_v12 = vpack.c.bf16 %v1505_v6, %v1498_v2  ;;  %v1856_v2 = vpack.c.bf16 %v1559_v48, %v1556_v43  ;;  %v1857_v6 = vld [vmem:[#allocation16_spill] sm:$0xff]  ;;  %v1870_v43 = vld [vmem:[#allocation22_spill] sm:$0xff]  ;;  %v963_v48 = vmul.f32 %v1871_v41, %v1871_v41 }
  0xa6   :  { %v971_v51 = vrot.slane %v963_v48, %v1872_v50 }
  0xa8   :  { %v975_v40 = vsel %vm957_vm0, %v971_v51, 0.0 }
  0xaa   :  { %425 = vmatmul.mubr.f32.vlgmr.msra.gmra.mrb[0].mxu1 %v1572_v56  ;;  %839 = vmatmul.mubr.f32.vlgmr.msra.gmra.mrb[0].mxu0 %v1572_v56 }
  0xab   :  { %1062 = vmatpush1.bf16.xpose.msra.mxu1 %v1842_v14  ;;  %1158 = vmatpush1.bf16.xpose.msra.mxu0 %v1342_v15  ;;  %v1847_v15 = vld [vmem:[#allocation9_spill] sm:$0xff] }
  0xac   :  { %1064 = vmatprep.subr.bf16.mxu1 %v1843_v44  ;;  %1160 = vmatprep.subr.bf16.mxu0 %v1348_v16  ;;  %v1849_v16 = vld [vmem:[#allocation12_spill] sm:$0xff] }
  0xad   :  { %560 = vmatprep.mubr.f32.mxu1 %v1435_v54  ;;  %941 = vmatprep.mubr.f32.mxu0 %v1430_v52  ;;  %v1850_v52 = vpack.c.bf16 %v1537_v8, %v1532_v7  ;;  %v1851_v54 = vld [vmem:[#allocation13_spill] sm:$0xff]  ;;  %v1861_v7 = vld [vmem:[#allocation18_spill] sm:$0xff]  ;;  %v1862_v8 = vpack.c.bf16 %v1580_v58, %v1578_v53  ;;  %v1869_v53 = vld [vmem:[#allocation23_spill] sm:$0xff]  ;;  %v972_v58 = vcombine.high %v971_v51, %v971_v51 }
  0xaf   :  { %v976_v59 = vsel %vm957_vm0, %v972_v58, 0.0 }
  0xb0   :  { %v977_v36 = vadd.f32 %v976_v59, %v975_v40 }
  0xb2   :  { %978 = vadd.xlane.f32.xlu0 %v977_v36 }
  0xb3   :  { %1066 = vmatpush1.bf16.xpose.msra.mxu1 %v1844_v12  ;;  %1162 = vmatpush1.bf16.xpose.msra.mxu0 %v1845_v21 }
  0xb4   :  { %1068 = vmatprep.subr.bf16.mxu1 %v1846_v19  ;;  %1164 = vmatprep.subr.bf16.mxu0 %v1847_v15 }
  0xbb   :  { %1070 = vmatpush1.bf16.xpose.msra.mxu1 %v1848_v20  ;;  %1166 = vmatpush1.bf16.xpose.msra.mxu0 %v1849_v16 }
  0xbc   :  { %1072 = vmatprep.subr.bf16.mxu1 %v1850_v52  ;;  %1168 = vmatprep.subr.bf16.mxu0 %v1851_v54 }
  0xc3   :  { %1074 = vmatpush1.bf16.xpose.msra.mxu1 %v1852_v25  ;;  %1170 = vmatpush1.bf16.xpose.msra.mxu0 %v1853_v0 }
  0xc4   :  { %1076 = vmatprep.subr.bf16.mxu1 %v1854_v1  ;;  %1172 = vmatprep.subr.bf16.mxu0 %v1855_v39 }
  0xcb   :  { %1078 = vmatpush1.bf16.xpose.msra.mxu1 %v1856_v2  ;;  %1174 = vmatpush1.bf16.xpose.msra.mxu0 %v1857_v6 }
  0xcc   :  { %1080 = vmatprep.subr.bf16.mxu1 %v1858_v9  ;;  %1176 = vmatprep.subr.bf16.mxu0 %v1859_v10 }
  0xd3   :  { %1082 = vmatpush1.bf16.xpose.msra.mxu1 %v1860_v5  ;;  %1178 = vmatpush1.bf16.xpose.msra.mxu0 %v1861_v7 }
  0xd4   :  { %1084 = vmatprep.subr.bf16.mxu1 %v1862_v8  ;;  %1180 = vmatprep.subr.bf16.mxu0 %v1863_v28 }
  0xdb   :  { %1086 = vmatpush1.bf16.xpose.msra.mxu1 %v1864_v38  ;;  %1182 = vmatpush1.bf16.xpose.msra.mxu0 %v1865_v30 }
  0xdc   :  { %1088 = vmatprep.subr.bf16.mxu1 %v1866_v17  ;;  %1184 = vmatprep.subr.bf16.mxu0 %v1867_v4 }
  0xe3   :  { %1090 = vmatpush1.bf16.xpose.msra.mxu1 %v1868_v11  ;;  %1186 = vmatpush1.bf16.xpose.msra.mxu0 %v1869_v53 }
  0xea   :  { %563 = vmatmul.mubr.f32.vlgmr.msra.gmra.mrb[0].mxu1 %v1870_v43  ;;  %943 = vmatmul.mubr.f32.vlgmr.msra.gmra.mrb[0].mxu0 %v1572_v56  ;;  %v994_v56 = vld [vmem:[%s1790_s2] ss:$0 sm:$0xff] }
 0x13f   :  { %v979_v23 = vpop.xlane.xlu0 %978 }
 0x1bd   :  { %v564_v60 = vpop.f32.mrb[0].mxu1  ;;  %v944_v13 = vpop.f32.mrb[0].mxu0 }
 0x1be   :  { %v1187_v33 = vadd.f32 %v944_v13, %v564_v60  ;;  %v566_v37 = vpop.f32.mrb[1].mxu1  ;;  %v946_v47 = vpop.f32.mrb[1].mxu0 }
 0x1c0   :  { %v949_v63 = vmul.f32 2.0, %v1187_v33 }
 0x1c2   :  { %v956_v32 = vsub.f32 %v994_v56, %v949_v63 }
 0x1c4   :  { %v958_v29 = vsel %vm957_vm0, %v956_v32, inf }
 0x1c5   :  { %959 = vmin.index.xlane.f32.xlu1 %v958_v29  ;;  %980 = vmin.xlane.f32.xlu0 %v958_v29 }
 0x252   :  { %v960_v27 = vpop.xlane.xlu1 %959  ;;  %v981_v22 = vpop.xlane.xlu0 %980 }
 0x253   :  { %962 = vst.msk [vmem:[%s1791_s3] sm:$0x3] %vm961_vm1, %v960_v27  ;;  %v982_v57 = vadd.f32 %v981_v22, %v979_v23 }
 0x255   :  { %983 = vst.msk [vmem:[%s1792_s4] sm:$0x3] %vm961_vm1, %v982_v57 }
 0x256   :  { %992 = vsyncpa [#allocation3], 1 }
 0x257   :  { %993 = vsyncpa [#allocation5], 1 }

// kernel: tpu_custom_call.1
= control target key start
LH: loop header
LB: loop body
LE: loop exit
PB: predicated region body
PF: predicated region fallthrough
CT: control target
= control target key end

     0   :  { %10 = vsyncpa [#allocation3], 0  ;;  %s1788_s0 = inlined_call_operand.hbm [shape: f32[2,256], index: 0, kind: input, shape index: {}]   ;;  %s1789_s1 = inlined_call_operand.hbm [shape: f32[128,256], index: 1, kind: input, shape index: {}]   ;;  %s1790_s2 = inlined_call_operand.vmem [shape: f32[1,128], index: 2, kind: input, shape index: {}]   ;;  %s1791_s3 = inlined_call_operand.vmem [shape: s32[2,1], index: 3, kind: output, shape index: {0}]   ;;  %s1792_s4 = inlined_call_operand.vmem [shape: f32[2,1], index: 4, kind: output, shape index: {1}]  }
   0x1   :  { %11 = vsyncpa [#allocation5], 0  ;;  %s1249_s15 = smov [#allocation2]   ;;  %s1250_s17 = smov [#allocation4]  }
   0x2   :  { %s18_s16 = sshll.u32 %s1249_s15, 4  ;;  %s27_s18 = sshll.u32 %s1250_s17, 4  ;;  %s19_s16 = int_to_ptr.vmem [resolvable:$true] %s18_s16  ;;  %s1279_s18 = int_to_ptr.vmem [resolvable:$true] %s27_s18 }
   0x3   :  { %s1201_s21 = scalar_lea.hbm %s1788_s0, 64 }
   0x4   :  { %p1202_p0 = scmp.ne.s32.totalorder %s1788_s0, %s1201_s21  ;;  %p1205_p1 = scmp.lt.u32.totalorder %s1201_s21, %s1788_s0 }
   0x6   :  { %p1207_p2 = pnand %p1205_p1, %p1202_p0 }
   0x8   :  { %1210 = shalt.err (!%p1207_p2)
}
   0x9   :  { %s1211_s26 = scalar_lea.vmem %s19_s16, 64  ;;  %p1216_p4 = scmp.lt.s32.totalorder %s19_s16, %s19_s16 }
   0xa   :  { %p1212_p3 = scmp.ne.s32.totalorder %s19_s16, %s1211_s26  ;;  %p1217_p5 = scmp.lt.s32.totalorder %s1211_s26, %s1211_s26 }
   0xc   :  { %p1218_p6 = por %p1217_p5, %p1216_p4 }
   0xe   :  { %p1219_p7 = pnand %p1218_p6, %p1212_p3 }
  0x10   :  { %1222 = shalt.err (!%p1219_p7)
}
  0x11   :  { %21 = dma.hbm_to_vmem [thread:$0]  %s1788_s0, 64, %s19_s16, [#allocation3]  }
  0x12   :  { %s1223_s5 = scalar_lea.hbm %s1789_s1, 4096 }
  0x13   :  { %p1224_p8 = scmp.ne.s32.totalorder %s1789_s1, %s1223_s5  ;;  %p1227_p9 = scmp.lt.u32.totalorder %s1223_s5, %s1789_s1 }
  0x15   :  { %p1229_p10 = pnand %p1227_p9, %p1224_p8 }
  0x17   :  { %1232 = shalt.err (!%p1229_p10)
}
  0x18   :  { %s1233_s10 = scalar_lea.vmem %s1279_s18, 4096  ;;  %p1238_p12 = scmp.lt.s32.totalorder %s1279_s18, %s1279_s18 }
  0x19   :  { %p1234_p11 = scmp.ne.s32.totalorder %s1279_s18, %s1233_s10  ;;  %p1239_p13 = scmp.lt.s32.totalorder %s1233_s10, %s1233_s10 }
  0x1b   :  { %p1240_p0 = por %p1239_p13, %p1238_p12 }
  0x1d   :  { %p1241_p1 = pnand %p1240_p0, %p1234_p11 }
  0x1f   :  { %1244 = shalt.err (!%p1241_p1)
}
  0x20   :  { %s1251_s0 = smov 256   ;;  %s1252_s11 = smov 16  }
  0x21   :  { %33 = dma.hbm_to_vmem [thread:$0]  %s1789_s1, 4096, %s1279_s18, [#allocation5], %s1251_s0, %s1251_s0, %s1252_s11  }
  0x22   :  { %1245 = dma.done.wait [#allocation3], 64  }
  0x23   :  { %1246 = vsyncadd [#allocation3], 4294967232 }
  0x24   :  { %1247 = dma.done.wait [#allocation5], 4096  }
  0x25   :  { %1248 = vsyncadd [#allocation5], 4294963200  ;;  %v1310_v0 = vld [vmem:[#allocation4 + $0x8] sm:$0xff]  ;;  %v1312_v1 = vld [vmem:[#allocation4 + $0x18] sm:$0xff]  ;;  %v1253_v23 = vmov 1983009808   ;;  %v79_v25 = vlaneseq }
  0x26   :  { %v1314_v2 = vld [vmem:[#allocation4] sm:$0xff]  ;;  %v86_v3 = vand.u32 4294901760, %v1310_v0  ;;  %v90_v4 = vand.u32 4294901760, %v1312_v1  ;;  %v1318_v5 = vld [vmem:[#allocation4 + $0x10] sm:$0xff]  ;;  %v1321_v7 = vld [vmem:[#allocation4 + $0x28] sm:$0xff]  ;;  %v77_v24 = vunpack.c.l.s4 %v1253_v23  ;;  %vm957_vm0 = vcmask 1041408  }
  0x27   :  { %v88_v6 = vand.u32 4294901760, %v1314_v2  ;;  %v1323_v8 = vld [vmem:[#allocation4 + $0x38] sm:$0xff]  ;;  %v92_v9 = vand.u32 4294901760, %v1318_v5  ;;  %v94_v10 = vand.u32 4294901760, %v1321_v7  ;;  %v1334_v13 = vld [vmem:[#allocation4 + $0x20] sm:$0xff]  ;;  %v1336_v14 = vld [vmem:[#allocation4 + $0x30] sm:$0xff] }
  0x28   :  { %v98_v11 = vand.u32 4294901760, %v1323_v8  ;;  %v1332_v12 = vpack.c.bf16 %v90_v4, %v86_v3  ;;  %v1350_v17 = vld [vmem:[#allocation4 + $0x48] sm:$0xff]  ;;  %v1352_v18 = vld [vmem:[#allocation4 + $0x58] sm:$0xff]  ;;  %v1800_v19 = vand.u32 4294901760, %v1334_v13  ;;  %v1799_v20 = vand.u32 4294901760, %v1336_v14  ;;  %v1376_v28 = vld [vmem:[#allocation4 + $0x40] sm:$0xff] }
  0x29   :  { %v1342_v15 = vpack.c.bf16 %v92_v9, %v88_v6  ;;  %v1798_v21 = vand.u32 4294901760, %v1350_v17  ;;  %v1797_v22 = vand.u32 4294901760, %v1352_v18  ;;  %v1378_v29 = vld [vmem:[#allocation4 + $0x50] sm:$0xff]  ;;  %v1380_v30 = vld [vmem:[#allocation4 + $0x68] sm:$0xff]  ;;  %v1382_v31 = vld [vmem:[#allocation4 + $0x78] sm:$0xff]  ;;  %v78_v32 = vunpack.c.0.s8 %v77_v24 }
  0x2a   :  { %v1348_v16 = vpack.c.bf16 %v98_v11, %v94_v10  ;;  %996 = vmatprep.subr.bf16.mxu1 %v1332_v12  ;;  %1092 = vmatprep.subr.bf16.mxu0 %v1332_v12  ;;  %v1368_v26 = vpack.c.bf16 %v1799_v20, %v1800_v19  ;;  %v80_v33 = vshrl.u32 %v79_v25, 7  ;;  %v1796_v34 = vand.u32 4294901760, %v1376_v28  ;;  %v1394_v39 = vld [vmem:[#allocation2] sm:$0xf]  ;;  %v1408_v42 = vld [vmem:[#allocation4 + $0x60] sm:$0xff]  ;;  %v1410_v43 = vld [vmem:[#allocation4 + $0x70] sm:$0xff] }
  0x2b   :  { %998 = vmatpush1.bf16.xpose.msra.mxu1 %v1342_v15  ;;  %1094 = vmatpush1.bf16.xpose.msra.mxu0 %v1342_v15  ;;  %v1374_v27 = vpack.c.bf16 %v1797_v22, %v1798_v21  ;;  %v1795_v35 = vand.u32 4294901760, %v1378_v29  ;;  %v1794_v36 = vand.u32 4294901760, %v1380_v30  ;;  %v1793_v37 = vand.u32 4294901760, %v1382_v31  ;;  %1820 = vst [vmem:[#allocation11_spill] sm:$0xff] %v1394_v39  ;;  %v1412_v44 = vld [vmem:[#allocation4 + $0x88] sm:$0xff]  ;;  %v1414_v45 = vld [vmem:[#allocation4 + $0x98] sm:$0xff] }
  0x2c   :  { %1000 = vmatprep.subr.bf16.mxu1 %v1348_v16  ;;  %1096 = vmatprep.subr.bf16.mxu0 %v1348_v16  ;;  %1817 = vst [vmem:[#allocation8_spill] sm:$0xff] %v1368_v26  ;;  %v1392_v38 = vsub.s32 %v78_v32, %v80_v33  ;;  %v112_v47 = vand.u32 4294901760, %v1408_v42  ;;  %v116_v48 = vand.u32 4294901760, %v1410_v43  ;;  %v118_v50 = vand.u32 4294901760, %v1412_v44  ;;  %v1439_v56 = vld [vmem:[#allocation4 + $0x80] sm:$0xff]  ;;  %v1441_v57 = vld [vmem:[#allocation4 + $0x90] sm:$0xff] }
  0x2d   :  { %1818 = vst [vmem:[#allocation9_spill] sm:$0xff] %v1374_v27  ;;  %v1400_v40 = vpack.c.bf16 %v1795_v35, %v1796_v34  ;;  %v1406_v41 = vpack.c.bf16 %v1793_v37, %v1794_v36  ;;  %v122_v51 = vand.u32 4294901760, %v1414_v45  ;;  %v1443_v58 = vld [vmem:[#allocation4 + $0xa8] sm:$0xff]  ;;  %v1445_v59 = vld [vmem:[#allocation4 + $0xb8] sm:$0xff]  ;;  %v120_v61 = vand.u32 4294901760, %v1439_v56  ;;  %v65_v37 = vld [vmem:[#allocation4 + $0xb0] sm:$0xff] }
  0x2e   :  { %1819 = vst [vmem:[#allocation10_spill] sm:$0xff] %v1392_v38  ;;  %v1418_v46 = vrot.slane %v1394_v39, %v1392_v38  ;;  %v1432_v53 = vpack.c.bf16 %v116_v48, %v112_v47  ;;  %v124_v62 = vand.u32 4294901760, %v1441_v57  ;;  %v126_v23 = vand.u32 4294901760, %v1443_v58  ;;  %v68_v36 = vld [vmem:[#allocation4 + $0xc8] sm:$0xff]  ;;  %v70_v35 = vld [vmem:[#allocation4 + $0xd8] sm:$0xff] }
  0x2f   :  { %1821 = vst [vmem:[#allocation12_spill] sm:$0xff] %v1400_v40  ;;  %1822 = vst [vmem:[#allocation13_spill] sm:$0xff] %v1406_v41  ;;  %v1437_v55 = vpack.c.bf16 %v122_v51, %v118_v50  ;;  %v130_v24 = vand.u32 4294901760, %v1445_v59  ;;  %v132_v22 = vand.u32 4294901760, %v65_v37  ;;  %v1473_v21 = vsub.f32 %v1312_v1, %v90_v4 }
  0x30   :  { %v83_v49 = vcombine.high %v1418_v46, %v1418_v46  ;;  %1823 = vst [vmem:[#allocation14_spill] sm:$0xff] %v1432_v53  ;;  %v1457_v32 = vpack.c.bf16 %v124_v62, %v120_v61  ;;  %v1478_v20 = vsub.f32 %v1314_v2, %v88_v6  ;;  %v1483_v19 = vsub.f32 %v1318_v5, %v92_v9 }
  0x31   :  { %1824 = vst [vmem:[#allocation15_spill] sm:$0xff] %v1437_v55  ;;  %v1459_v33 = vpack.c.bf16 %v130_v24, %v126_v23  ;;  %v1493_v1 = vsub.f32 %v1323_v8, %v98_v11  ;;  %v1829_v5 = vand.u32 4294901760, %v1336_v14  ;;  %v1831_v8 = vand.u32 4294901760, %v1352_v18 }
  0x32   :  { %v1430_v52 = vand.u32 4294901760, %v83_v49  ;;  %1825 = vst [vmem:[#allocation16_spill] sm:$0xff] %v1457_v32  ;;  %v1833_v38 = vand.u32 4294901760, %v1376_v28  ;;  %vm961_vm1 = vcmask 1024  }
  0x33   :  { %1002 = vmatpush1.bf16.xpose.msra.mxu1 %v1368_v26  ;;  %1098 = vmatpush1.bf16.xpose.msra.mxu0 %v1368_v26  ;;  %1826 = vst [vmem:[#allocation17_spill] sm:$0xff] %v1459_v33  ;;  %v1505_v6 = vsub.f32 %v1336_v14, %v1829_v5  ;;  %v1834_v14 = vand.u32 4294901760, %v1378_v29 }
  0x34   :  { %1004 = vmatprep.subr.bf16.mxu1 %v1374_v27  ;;  %1100 = vmatprep.subr.bf16.mxu0 %v1374_v27  ;;  %v1435_v54 = vsub.f32 %v83_v49, %v1430_v52  ;;  %v63_v49 = vld [vmem:[#allocation4 + $0xa0] sm:$0xff]  ;;  %v1522_v39 = vsub.f32 %v1376_v28, %v1833_v38  ;;  %v1540_v28 = vsub.f32 %v1408_v42, %v112_v47 }
  0x35   :  { %v128_v34 = vand.u32 4294901760, %v63_v49  ;;  %v1527_v5 = vsub.f32 %v1378_v29, %v1834_v14  ;;  %v1543_v38 = vsub.f32 %v1410_v43, %v116_v48  ;;  %v212_v14 = vand.u32 4294901760, %v1473_v21  ;;  %v71_v47 = vld [vmem:[#allocation4 + $0xe0] sm:$0xff] }
  0x36   :  { %v184_v60 = vand.u32 4294901760, %v1435_v54  ;;  %v1556_v43 = vsub.f32 %v1439_v56, %v120_v61  ;;  %v1559_v48 = vsub.f32 %v1441_v57, %v124_v62  ;;  %v1572_v56 = vand.u32 4294901760, %v1418_v46 }
  0x37   :  { %v1500_v4 = vpack.c.bf16 %v132_v22, %v128_v34  ;;  %v144_v61 = vand.u32 4294901760, %v71_v47 }
  0x38   :  { %v185_v63 = vsub.f32 %v1435_v54, %v184_v60  ;;  %667 = vmatprep.mubr.f32.mxu0 %v184_v60  ;;  %v134_v60 = vand.u32 4294901760, %v68_v36 }
  0x39   :  { %1828 = vst [vmem:[#allocation18_spill] sm:$0xff] %v1500_v4 }
  0x3a   :  { %v186_v25 = vand.u32 4294901760, %v185_v63  ;;  %v138_v63 = vand.u32 4294901760, %v70_v35 }
  0x3b   :  { %1006 = vmatpush1.bf16.xpose.msra.mxu1 %v1400_v40  ;;  %1102 = vmatpush1.bf16.xpose.msra.mxu0 %v1400_v40 }
  0x3c   :  { %1008 = vmatprep.subr.bf16.mxu1 %v1406_v41  ;;  %1104 = vmatprep.subr.bf16.mxu0 %v1406_v41  ;;  %v1517_v11 = vpack.c.bf16 %v138_v63, %v134_v60 }
  0x3d   :  { %187 = vmatprep.mubr.f32.mxu1 %v186_v25  ;;  %v1468_v25 = vsub.f32 %v1310_v0, %v86_v3  ;;  %v1488_v0 = vsub.f32 %v1321_v7, %v94_v10  ;;  %v1827_v3 = vand.u32 4294901760, %v1334_v13  ;;  %v1830_v7 = vand.u32 4294901760, %v1350_v17 }
  0x3e   :  { %v1515_v10 = vsub.f32 %v1352_v18, %v1831_v8  ;;  %1832 = vst [vmem:[#allocation19_spill] sm:$0xff] %v1517_v11  ;;  %v1836_v18 = vand.u32 4294901760, %v1382_v31 }
  0x3f   :  { %v1498_v2 = vsub.f32 %v1334_v13, %v1827_v3  ;;  %v1510_v9 = vsub.f32 %v1350_v17, %v1830_v7  ;;  %v67_v13 = vld [vmem:[#allocation4 + $0xc0] sm:$0xff]  ;;  %v69_v3 = vld [vmem:[#allocation4 + $0xd0] sm:$0xff]  ;;  %v1835_v17 = vand.u32 4294901760, %v1380_v30  ;;  %v200_v29 = vand.u32 4294901760, %v1468_v25 }
  0x40   :  { %v1537_v8 = vsub.f32 %v1382_v31, %v1836_v18  ;;  %v136_v31 = vand.u32 4294901760, %v67_v13  ;;  %v140_v42 = vand.u32 4294901760, %v69_v3  ;;  %v73_v18 = vld [vmem:[#allocation4 + $0xf0] sm:$0xff] }
  0x41   :  { %v1532_v7 = vsub.f32 %v1380_v30, %v1835_v17  ;;  %v1548_v30 = vsub.f32 %v1412_v44, %v118_v50  ;;  %v1551_v17 = vsub.f32 %v1414_v45, %v122_v51  ;;  %v1564_v50 = vsub.f32 %v1443_v58, %v126_v23 }
  0x42   :  { %v1567_v51 = vsub.f32 %v1445_v59, %v130_v24  ;;  %v148_v57 = vand.u32 4294901760, %v73_v18  ;;  %v201_v62 = vsub.f32 %v1468_v25, %v200_v29  ;;  %v1580_v58 = vsub.f32 %v70_v35, %v138_v63 }
  0x43   :  { %1010 = vmatpush1.bf16.xpose.msra.mxu1 %v1432_v53  ;;  %1106 = vmatpush1.bf16.xpose.msra.mxu0 %v1432_v53  ;;  %v1578_v53 = vsub.f32 %v68_v36, %v134_v60  ;;  %v1582_v23 = vpack.c.bf16 %v140_v42, %v136_v31  ;;  %v1584_v59 = vsub.f32 %v67_v13, %v136_v31  ;;  %v206_v24 = vand.u32 4294901760, %v1478_v20 }
  0x44   :  { %1012 = vmatprep.subr.bf16.mxu1 %v1437_v55  ;;  %1108 = vmatprep.subr.bf16.mxu0 %v1437_v55  ;;  %v213_v55 = vsub.f32 %v1473_v21, %v212_v14  ;;  %v1590_v41 = vsub.f32 %v69_v3, %v140_v42  ;;  %v224_v35 = vand.u32 4294901760, %v1488_v0  ;;  %v202_v60 = vand.u32 4294901760, %v201_v62 }
  0x45   :  { %1837 = vst [vmem:[#allocation20_spill] sm:$0xff] %v1582_v23  ;;  %v1605_v13 = vsub.f32 %v71_v47, %v144_v61  ;;  %v1123_v3 = vpack.c.bf16 %v212_v14, %v200_v29  ;;  %v230_v14 = vand.u32 4294901760, %v1498_v2  ;;  %v248_v29 = vand.u32 4294901760, %v1510_v9 }
  0x46   :  { %v214_v63 = vand.u32 4294901760, %v213_v55  ;;  %v225_v47 = vsub.f32 %v1488_v0, %v224_v35 }
  0x47   :  { %v231_v27 = vsub.f32 %v1498_v2, %v230_v14  ;;  %v249_v26 = vsub.f32 %v1510_v9, %v248_v29 }
  0x48   :  { %v226_v62 = vand.u32 4294901760, %v225_v47 }
  0x4b   :  { %1014 = vmatpush1.bf16.xpose.msra.mxu1 %v1457_v32  ;;  %1110 = vmatpush1.bf16.xpose.msra.mxu0 %v1457_v32  ;;  %v74_v32 = vld [vmem:[#allocation4 + $0xf8] sm:$0xff] }
  0x4c   :  { %1016 = vmatprep.subr.bf16.mxu1 %v1459_v33  ;;  %1112 = vmatprep.subr.bf16.mxu0 %v1459_v33  ;;  %v72_v33 = vld [vmem:[#allocation4 + $0xe8] sm:$0xff]  ;;  %v146_v45 = vand.u32 4294901760, %v74_v32 }
  0x4d   :  { %v142_v44 = vand.u32 4294901760, %v72_v33 }
  0x4e   :  { %v1599_v36 = vsub.f32 %v74_v32, %v146_v45  ;;  %v207_v32 = vsub.f32 %v1478_v20, %v206_v24 }
  0x4f   :  { %v1592_v40 = vsub.f32 %v72_v33, %v142_v44  ;;  %v1607_v33 = vsub.f32 %v73_v18, %v148_v57  ;;  %v1027_v18 = vpack.c.bf16 %v214_v63, %v202_v60  ;;  %v260_v60 = vand.u32 4294901760, %v1515_v10 }
  0x53   :  { %1018 = vmatpush1.bf16.xpose.msra.mxu1 %v1500_v4  ;;  %1114 = vmatpush1.bf16.xpose.msra.mxu0 %v1500_v4  ;;  %v1569_v4 = vsub.f32 %v63_v49, %v128_v34  ;;  %v1586_v34 = vpack.c.bf16 %v146_v45, %v142_v44  ;;  %v218_v49 = vand.u32 4294901760, %v1483_v19  ;;  %v208_v45 = vand.u32 4294901760, %v207_v32 }
  0x54   :  { %1020 = vmatprep.subr.bf16.mxu1 %v1517_v11  ;;  %1116 = vmatprep.subr.bf16.mxu0 %v1517_v11  ;;  %v1576_v11 = vsub.f32 %v65_v37, %v132_v22  ;;  %v1596_v22 = vsub.f32 %v1418_v46, %v1572_v56  ;;  %v1601_v37 = vpack.c.bf16 %v148_v57, %v144_v61  ;;  %v236_v46 = vand.u32 4294901760, %v1493_v1 }
  0x55   :  { %1838 = vst [vmem:[#allocation21_spill] sm:$0xff] %v1586_v34  ;;  %v219_v31 = vsub.f32 %v1483_v19, %v218_v49  ;;  %v242_v44 = vand.u32 4294901760, %v1505_v6 }
  0x56   :  { %1839 = vst [vmem:[#allocation22_spill] sm:$0xff] %v1596_v22  ;;  %1840 = vst [vmem:[#allocation23_spill] sm:$0xff] %v1601_v37  ;;  %v190_v42 = vand.u32 4294901760, %v1596_v22  ;;  %v237_v57 = vsub.f32 %v1493_v1, %v236_v46 }
  0x57   :  { %v220_v61 = vand.u32 4294901760, %v219_v31  ;;  %v243_v32 = vsub.f32 %v1505_v6, %v242_v44 }
  0x58   :  { %v191_v63 = vsub.f32 %v1596_v22, %v190_v42  ;;  %v238_v55 = vand.u32 4294901760, %v237_v57  ;;  %v254_v57 = vand.u32 4294901760, %v1522_v39 }
  0x59   :  { %v1029_v22 = vpack.c.bf16 %v220_v61, %v208_v45  ;;  %v244_v47 = vand.u32 4294901760, %v243_v32  ;;  %v290_v32 = vand.u32 4294901760, %v1543_v38 }
  0x5a   :  { %v1031_v31 = vpack.c.bf16 %v238_v55, %v226_v62 }
  0x5b   :  { %1022 = vmatpush1.bf16.xpose.msra.mxu1 %v1582_v23  ;;  %1118 = vmatpush1.bf16.xpose.msra.mxu0 %v1582_v23  ;;  %v1125_v23 = vpack.c.bf16 %v218_v49, %v206_v24  ;;  %v266_v24 = vand.u32 4294901760, %v1527_v5  ;;  %v250_v49 = vand.u32 4294901760, %v249_v26 }
  0x5c   :  { %1024 = vmatprep.subr.bf16.mxu1 %v1586_v34  ;;  %1120 = vmatprep.subr.bf16.mxu0 %v1586_v34  ;;  %v192_v34 = vand.u32 4294901760, %v191_v63  ;;  %v278_v63 = vand.u32 4294901760, %v1540_v28 }
  0x63   :  { %1026 = vmatpush1.bf16.xpose.msra.mxu1 %v1601_v37  ;;  %1122 = vmatpush1.bf16.xpose.msra.mxu0 %v1601_v37  ;;  %v1127_v37 = vpack.c.bf16 %v236_v46, %v224_v35  ;;  %v272_v35 = vand.u32 4294901760, %v1532_v7  ;;  %v284_v46 = vand.u32 4294901760, %v1537_v8 }
  0x64   :  { %1028 = vmatprep.subr.bf16.mxu1 %v1027_v18  ;;  %1124 = vmatprep.subr.bf16.mxu0 %v1123_v3  ;;  %v261_v18 = vsub.f32 %v1515_v10, %v260_v60  ;;  %v232_v3 = vand.u32 4294901760, %v231_v27  ;;  %v255_v27 = vsub.f32 %v1522_v39, %v254_v57 }
  0x65   :  { %v285_v26 = vsub.f32 %v1537_v8, %v284_v46 }
  0x66   :  { %v262_v45 = vand.u32 4294901760, %v261_v18  ;;  %v256_v61 = vand.u32 4294901760, %v255_v27  ;;  %v1133_v18 = vpack.c.bf16 %v266_v24, %v254_v57 }
  0x68   :  { %v1035_v55 = vpack.c.bf16 %v262_v45, %v250_v49  ;;  %v1135_v45 = vpack.c.bf16 %v284_v46, %v272_v35 }
  0x6a   :  { %193 = vmatmul.mubr.f32.vlgmr.msra.gmra.mrb[0].mxu1 %v192_v34  ;;  %671 = vmatmul.mubr.f32.vlgmr.msra.gmra.mrb[0].mxu0 %v190_v42  ;;  %v1033_v34 = vpack.c.bf16 %v244_v47, %v232_v3  ;;  %v1131_v42 = vpack.c.bf16 %v260_v60, %v248_v29  ;;  %v308_v29 = vand.u32 4294901760, %v1551_v17  ;;  %v279_v3 = vsub.f32 %v1540_v28, %v278_v63 }
  0x6b   :  { %1030 = vmatpush1.bf16.xpose.msra.mxu1 %v1029_v22  ;;  %1126 = vmatpush1.bf16.xpose.msra.mxu0 %v1125_v23  ;;  %v1129_v23 = vpack.c.bf16 %v242_v44, %v230_v14  ;;  %v267_v22 = vsub.f32 %v1527_v5, %v266_v24  ;;  %v286_v44 = vand.u32 4294901760, %v285_v26  ;;  %v291_v47 = vsub.f32 %v1543_v38, %v290_v32 }
  0x6c   :  { %1032 = vmatprep.subr.bf16.mxu1 %v1031_v31  ;;  %1128 = vmatprep.subr.bf16.mxu0 %v1127_v37  ;;  %v273_v37 = vsub.f32 %v1532_v7, %v272_v35  ;;  %v296_v31 = vand.u32 4294901760, %v1548_v30  ;;  %v280_v27 = vand.u32 4294901760, %v279_v3  ;;  %v332_v35 = vand.u32 4294901760, %v1567_v51 }
  0x6d   :  { %423 = vmatprep.mubr.f32.mxu1 %v1430_v52  ;;  %837 = vmatprep.mubr.f32.mxu0 %v1430_v52  ;;  %v268_v62 = vand.u32 4294901760, %v267_v22  ;;  %v292_v22 = vand.u32 4294901760, %v291_v47  ;;  %v1137_v26 = vpack.c.bf16 %v290_v32, %v278_v63 }
  0x6e   :  { %v274_v14 = vand.u32 4294901760, %v273_v37  ;;  %v320_v37 = vand.u32 4294901760, %v1564_v50 }
  0x6f   :  { %v1037_v60 = vpack.c.bf16 %v268_v62, %v256_v61  ;;  %v1041_v46 = vpack.c.bf16 %v292_v22, %v280_v27 }
  0x70   :  { %v1039_v49 = vpack.c.bf16 %v286_v44, %v274_v14  ;;  %v1139_v44 = vpack.c.bf16 %v308_v29, %v296_v31 }
  0x73   :  { %1034 = vmatpush1.bf16.xpose.msra.mxu1 %v1033_v34  ;;  %1130 = vmatpush1.bf16.xpose.msra.mxu0 %v1129_v23  ;;  %v297_v34 = vsub.f32 %v1548_v30, %v296_v31  ;;  %v309_v23 = vsub.f32 %v1551_v17, %v308_v29  ;;  %v356_v31 = vand.u32 4294901760, %v1580_v58 }
  0x74   :  { %1036 = vmatprep.subr.bf16.mxu1 %v1035_v55  ;;  %1132 = vmatprep.subr.bf16.mxu0 %v1131_v42  ;;  %v302_v55 = vand.u32 4294901760, %v1556_v43  ;;  %v314_v42 = vand.u32 4294901760, %v1559_v48 }
  0x75   :  { %v298_v57 = vand.u32 4294901760, %v297_v34  ;;  %v310_v24 = vand.u32 4294901760, %v309_v23  ;;  %v344_v34 = vand.u32 4294901760, %v1578_v53 }
  0x76   :  { %v303_v61 = vsub.f32 %v1556_v43, %v302_v55  ;;  %v315_v62 = vsub.f32 %v1559_v48, %v314_v42  ;;  %v1141_v23 = vpack.c.bf16 %v314_v42, %v302_v55 }
  0x77   :  { %v1043_v14 = vpack.c.bf16 %v310_v24, %v298_v57  ;;  %v1143_v24 = vpack.c.bf16 %v332_v35, %v320_v37 }
  0x78   :  { %v304_v3 = vand.u32 4294901760, %v303_v61  ;;  %v316_v47 = vand.u32 4294901760, %v315_v62 }
  0x7a   :  { %v1045_v29 = vpack.c.bf16 %v316_v47, %v304_v3 }
  0x7b   :  { %1038 = vmatpush1.bf16.xpose.msra.mxu1 %v1037_v60  ;;  %1134 = vmatpush1.bf16.xpose.msra.mxu0 %v1133_v18  ;;  %v321_v60 = vsub.f32 %v1564_v50, %v320_v37  ;;  %v333_v18 = vsub.f32 %v1567_v51, %v332_v35  ;;  %v380_v37 = vand.u32 4294901760, %v1599_v36 }
  0x7c   :  { %1040 = vmatprep.subr.bf16.mxu1 %v1039_v49  ;;  %1136 = vmatprep.subr.bf16.mxu0 %v1135_v45  ;;  %v326_v49 = vand.u32 4294901760, %v1569_v4  ;;  %v338_v45 = vand.u32 4294901760, %v1576_v11 }
  0x7d   :  { %v322_v63 = vand.u32 4294901760, %v321_v60  ;;  %v334_v32 = vand.u32 4294901760, %v333_v18  ;;  %v368_v60 = vand.u32 4294901760, %v1592_v40 }
  0x7e   :  { %v327_v27 = vsub.f32 %v1569_v4, %v326_v49  ;;  %v339_v22 = vsub.f32 %v1576_v11, %v338_v45  ;;  %v1145_v18 = vpack.c.bf16 %v338_v45, %v326_v49 }
  0x7f   :  { %v1047_v57 = vpack.c.bf16 %v334_v32, %v322_v63  ;;  %v1147_v32 = vpack.c.bf16 %v356_v31, %v344_v34 }
  0x80   :  { %v328_v61 = vand.u32 4294901760, %v327_v27  ;;  %v340_v62 = vand.u32 4294901760, %v339_v22 }
  0x82   :  { %v1049_v35 = vpack.c.bf16 %v340_v62, %v328_v61  ;;  %v1151_v62 = vpack.c.bf16 %v380_v37, %v368_v60 }
  0x83   :  { %1042 = vmatpush1.bf16.xpose.msra.mxu1 %v1041_v46  ;;  %1138 = vmatpush1.bf16.xpose.msra.mxu0 %v1137_v26  ;;  %v345_v46 = vsub.f32 %v1578_v53, %v344_v34  ;;  %v357_v26 = vsub.f32 %v1580_v58, %v356_v31 }
  0x84   :  { %1044 = vmatprep.subr.bf16.mxu1 %v1043_v14  ;;  %1140 = vmatprep.subr.bf16.mxu0 %v1139_v44  ;;  %v350_v14 = vand.u32 4294901760, %v1584_v59  ;;  %v362_v44 = vand.u32 4294901760, %v1590_v41 }
  0x85   :  { %v346_v55 = vand.u32 4294901760, %v345_v46  ;;  %v358_v42 = vand.u32 4294901760, %v357_v26 }
  0x86   :  { %v351_v3 = vsub.f32 %v1584_v59, %v350_v14  ;;  %v363_v47 = vsub.f32 %v1590_v41, %v362_v44  ;;  %v1149_v26 = vpack.c.bf16 %v362_v44, %v350_v14  ;;  %v1842_v14 = vpack.c.bf16 %v1483_v19, %v1478_v20 }
  0x87   :  { %v1051_v63 = vpack.c.bf16 %v358_v42, %v346_v55  ;;  %v1843_v44 = vpack.c.bf16 %v1493_v1, %v1488_v0  ;;  %v1846_v19 = vpack.c.bf16 %v1515_v10, %v1510_v9  ;;  %v1848_v20 = vpack.c.bf16 %v1527_v5, %v1522_v39  ;;  %v1853_v0 = vld [vmem:[#allocation14_spill] sm:$0xff]  ;;  %v1855_v39 = vld [vmem:[#allocation15_spill] sm:$0xff]  ;;  %v1859_v10 = vld [vmem:[#allocation17_spill] sm:$0xff] }
  0x88   :  { %v352_v27 = vand.u32 4294901760, %v351_v3  ;;  %v364_v22 = vand.u32 4294901760, %v363_v47  ;;  %v1841_v3 = vpack.c.bf16 %v1473_v21, %v1468_v25  ;;  %v1845_v21 = vld [vmem:[#allocation8_spill] sm:$0xff]  ;;  %v1852_v25 = vpack.c.bf16 %v1543_v38, %v1540_v28  ;;  %v1863_v28 = vld [vmem:[#allocation19_spill] sm:$0xff] }
  0x89   :  { %v1854_v1 = vpack.c.bf16 %v1551_v17, %v1548_v30  ;;  %v1858_v9 = vpack.c.bf16 %v1567_v51, %v1564_v50  ;;  %v1860_v5 = vpack.c.bf16 %v1576_v11, %v1569_v4  ;;  %v1864_v38 = vpack.c.bf16 %v1590_v41, %v1584_v59  ;;  %v1865_v30 = vld [vmem:[#allocation20_spill] sm:$0xff]  ;;  %v1867_v4 = vld [vmem:[#allocation21_spill] sm:$0xff]  ;;  %v1871_v41 = vld [vmem:[#allocation11_spill] sm:$0xff] }
  0x8a   :  { %v1053_v46 = vpack.c.bf16 %v364_v22, %v352_v27  ;;  %v1866_v17 = vpack.c.bf16 %v1599_v36, %v1592_v40  ;;  %v1868_v11 = vpack.c.bf16 %v1607_v33, %v1605_v13  ;;  %v1872_v50 = vld [vmem:[#allocation10_spill] sm:$0xff] }
  0x8b   :  { %1046 = vmatpush1.bf16.xpose.msra.mxu1 %v1045_v29  ;;  %1142 = vmatpush1.bf16.xpose.msra.mxu0 %v1141_v23  ;;  %v369_v29 = vsub.f32 %v1592_v40, %v368_v60  ;;  %v381_v23 = vsub.f32 %v1599_v36, %v380_v37 }
  0x8c   :  { %1048 = vmatprep.subr.bf16.mxu1 %v1047_v57  ;;  %1144 = vmatprep.subr.bf16.mxu0 %v1143_v24  ;;  %v374_v57 = vand.u32 4294901760, %v1605_v13  ;;  %v386_v24 = vand.u32 4294901760, %v1607_v33 }
  0x8d   :  { %v370_v49 = vand.u32 4294901760, %v369_v29  ;;  %v382_v45 = vand.u32 4294901760, %v381_v23 }
  0x8e   :  { %v375_v34 = vsub.f32 %v1605_v13, %v374_v57  ;;  %v387_v31 = vsub.f32 %v1607_v33, %v386_v24 }
  0x8f   :  { %v1055_v61 = vpack.c.bf16 %v382_v45, %v370_v49 }
  0x90   :  { %v376_v55 = vand.u32 4294901760, %v375_v34  ;;  %v388_v42 = vand.u32 4294901760, %v387_v31 }
  0x93   :  { %1050 = vmatpush1.bf16.xpose.msra.mxu1 %v1049_v35  ;;  %1146 = vmatpush1.bf16.xpose.msra.mxu0 %v1145_v18  ;;  %v1057_v35 = vpack.c.bf16 %v388_v42, %v376_v55  ;;  %v1153_v18 = vpack.c.bf16 %v386_v24, %v374_v57 }
  0x94   :  { %1052 = vmatprep.subr.bf16.mxu1 %v1051_v63  ;;  %1148 = vmatprep.subr.bf16.mxu0 %v1147_v32 }
  0x9b   :  { %1054 = vmatpush1.bf16.xpose.msra.mxu1 %v1053_v46  ;;  %1150 = vmatpush1.bf16.xpose.msra.mxu0 %v1149_v26 }
  0x9c   :  { %1056 = vmatprep.subr.bf16.mxu1 %v1055_v61  ;;  %1152 = vmatprep.subr.bf16.mxu0 %v1151_v62 }
  0xa3   :  { %1058 = vmatpush1.bf16.xpose.msra.mxu1 %v1057_v35  ;;  %1154 = vmatpush1.bf16.xpose.msra.mxu0 %v1153_v18 }
  0xa4   :  { %1060 = vmatprep.subr.bf16.mxu1 %v1841_v3  ;;  %1156 = vmatprep.subr.bf16.mxu0 %v1332_v12  ;;  %v1844_v12 = vpack.c.bf16 %v1505_v6, %v1498_v2  ;;  %v1856_v2 = vpack.c.bf16 %v1559_v48, %v1556_v43  ;;  %v1857_v6 = vld [vmem:[#allocation16_spill] sm:$0xff]  ;;  %v1870_v43 = vld [vmem:[#allocation22_spill] sm:$0xff]  ;;  %v963_v48 = vmul.f32 %v1871_v41, %v1871_v41 }
  0xa6   :  { %v971_v51 = vrot.slane %v963_v48, %v1872_v50 }
  0xa8   :  { %v975_v40 = vsel %vm957_vm0, %v971_v51, 0.0 }
  0xaa   :  { %425 = vmatmul.mubr.f32.vlgmr.msra.gmra.mrb[0].mxu1 %v1572_v56  ;;  %839 = vmatmul.mubr.f32.vlgmr.msra.gmra.mrb[0].mxu0 %v1572_v56 }
  0xab   :  { %1062 = vmatpush1.bf16.xpose.msra.mxu1 %v1842_v14  ;;  %1158 = vmatpush1.bf16.xpose.msra.mxu0 %v1342_v15  ;;  %v1847_v15 = vld [vmem:[#allocation9_spill] sm:$0xff] }
  0xac   :  { %1064 = vmatprep.subr.bf16.mxu1 %v1843_v44  ;;  %1160 = vmatprep.subr.bf16.mxu0 %v1348_v16  ;;  %v1849_v16 = vld [vmem:[#allocation12_spill] sm:$0xff] }
  0xad   :  { %560 = vmatprep.mubr.f32.mxu1 %v1435_v54  ;;  %941 = vmatprep.mubr.f32.mxu0 %v1430_v52  ;;  %v1850_v52 = vpack.c.bf16 %v1537_v8, %v1532_v7  ;;  %v1851_v54 = vld [vmem:[#allocation13_spill] sm:$0xff]  ;;  %v1861_v7 = vld [vmem:[#allocation18_spill] sm:$0xff]  ;;  %v1862_v8 = vpack.c.bf16 %v1580_v58, %v1578_v53  ;;  %v1869_v53 = vld [vmem:[#allocation23_spill] sm:$0xff]  ;;  %v972_v58 = vcombine.high %v971_v51, %v971_v51 }
  0xaf   :  { %v976_v59 = vsel %vm957_vm0, %v972_v58, 0.0 }
  0xb0   :  { %v977_v36 = vadd.f32 %v976_v59, %v975_v40 }
  0xb2   :  { %978 = vadd.xlane.f32.xlu0 %v977_v36 }
  0xb3   :  { %1066 = vmatpush1.bf16.xpose.msra.mxu1 %v1844_v12  ;;  %1162 = vmatpush1.bf16.xpose.msra.mxu0 %v1845_v21 }
  0xb4   :  { %1068 = vmatprep.subr.bf16.mxu1 %v1846_v19  ;;  %1164 = vmatprep.subr.bf16.mxu0 %v1847_v15 }
  0xbb   :  { %1070 = vmatpush1.bf16.xpose.msra.mxu1 %v1848_v20  ;;  %1166 = vmatpush1.bf16.xpose.msra.mxu0 %v1849_v16 }
  0xbc   :  { %1072 = vmatprep.subr.bf16.mxu1 %v1850_v52  ;;  %1168 = vmatprep.subr.bf16.mxu0 %v1851_v54 }
  0xc3   :  { %1074 = vmatpush1.bf16.xpose.msra.mxu1 %v1852_v25  ;;  %1170 = vmatpush1.bf16.xpose.msra.mxu0 %v1853_v0 }
  0xc4   :  { %1076 = vmatprep.subr.bf16.mxu1 %v1854_v1  ;;  %1172 = vmatprep.subr.bf16.mxu0 %v1855_v39 }
  0xcb   :  { %1078 = vmatpush1.bf16.xpose.msra.mxu1 %v1856_v2  ;;  %1174 = vmatpush1.bf16.xpose.msra.mxu0 %v1857_v6 }
  0xcc   :  { %1080 = vmatprep.subr.bf16.mxu1 %v1858_v9  ;;  %1176 = vmatprep.subr.bf16.mxu0 %v1859_v10 }
  0xd3   :  { %1082 = vmatpush1.bf16.xpose.msra.mxu1 %v1860_v5  ;;  %1178 = vmatpush1.bf16.xpose.msra.mxu0 %v1861_v7 }
  0xd4   :  { %1084 = vmatprep.subr.bf16.mxu1 %v1862_v8  ;;  %1180 = vmatprep.subr.bf16.mxu0 %v1863_v28 }
  0xdb   :  { %1086 = vmatpush1.bf16.xpose.msra.mxu1 %v1864_v38  ;;  %1182 = vmatpush1.bf16.xpose.msra.mxu0 %v1865_v30 }
  0xdc   :  { %1088 = vmatprep.subr.bf16.mxu1 %v1866_v17  ;;  %1184 = vmatprep.subr.bf16.mxu0 %v1867_v4 }
  0xe3   :  { %1090 = vmatpush1.bf16.xpose.msra.mxu1 %v1868_v11  ;;  %1186 = vmatpush1.bf16.xpose.msra.mxu0 %v1869_v53 }
  0xea   :  { %563 = vmatmul.mubr.f32.vlgmr.msra.gmra.mrb[0].mxu1 %v1870_v43  ;;  %943 = vmatmul.mubr.f32.vlgmr.msra.gmra.mrb[0].mxu0 %v1572_v56  ;;  %v994_v56 = vld [vmem:[%s1790_s2] ss:$0 sm:$0xff] }
 0x13f   :  { %v979_v23 = vpop.xlane.xlu0 %978 }
 0x1bd   :  { %v564_v60 = vpop.f32.mrb[0].mxu1  ;;  %v944_v13 = vpop.f32.mrb[0].mxu0 }
 0x1be   :  { %v1187_v33 = vadd.f32 %v944_v13, %v564_v60  ;;  %v566_v37 = vpop.f32.mrb[1].mxu1  ;;  %v946_v47 = vpop.f32.mrb[1].mxu0 }
 0x1c0   :  { %v949_v63 = vmul.f32 2.0, %v1187_v33 }
 0x1c2   :  { %v956_v32 = vsub.f32 %v994_v56, %v949_v63 }
 0x1c4   :  { %v958_v29 = vsel %vm957_vm0, %v956_v32, inf }
 0x1c5   :  { %959 = vmin.index.xlane.f32.xlu1 %v958_v29  ;;  %980 = vmin.xlane.f32.xlu0 %v958_v29 }
 0x252   :  { %v960_v27 = vpop.xlane.xlu1 %959  ;;  %v981_v22 = vpop.xlane.xlu0 %980 }
 0x253   :  { %962 = vst.msk [vmem:[%s1791_s3] sm:$0x3] %vm961_vm1, %v960_v27  ;;  %v982_v57 = vadd.f32 %v981_v22, %v979_v23 }
 0x255   :  { %983 = vst.msk [vmem:[%s1792_s4] sm:$0x3] %vm961_vm1, %v982_v57 }
 0x256   :  { %992 = vsyncpa [#allocation3], 1 }
 0x257   :  { %993 = vsyncpa [#allocation5], 1 }

</bundles_post_ra>
